<compile_context>
chip_gen: v6e
topology: v6e:2x2x1
jax: 0.10.0
libtpu: 0.0.40
codegen_flags: <defaults>
</compile_context>

<pallas_src>
import jax
import jax.numpy as jnp
from jax.experimental import pallas as pl
from jax.experimental.pallas import tpu as pltpu

HIDDEN = 128  # all hidden widths (64, 128, 32) padded to one lane-dense 128


def mlp_kernel(x_ref, w1_ref, b1_ref, w2_ref, b2_ref,
               w3_ref, b3_ref, w4_ref, b4_ref, o_ref):
    # fc1 + ReLU (bf16 MXU inputs -- cast in-kernel, f32 accumulate/elementwise)
    x = x_ref[...].astype(jnp.bfloat16)
    h = jnp.dot(x, w1_ref[...], preferred_element_type=jnp.float32)
    h = jnp.maximum(h + b1_ref[...], 0.0)
    # fc2 + ReLU
    h = jnp.dot(h.astype(jnp.bfloat16), w2_ref[...],
                preferred_element_type=jnp.float32)
    h = jnp.maximum(h + b2_ref[...], 0.0)
    # fc3 + ReLU
    h = jnp.dot(h.astype(jnp.bfloat16), w3_ref[...],
                preferred_element_type=jnp.float32)
    h = jnp.maximum(h + b3_ref[...], 0.0)
    # fc4 (output width 1): put the batch on the lane axis (XLU transpose,
    # otherwise-idle slot), then VPU multiply + sublane reduction.  The result
    # is born as a lane-dense (1, tile_b) row -> unmasked stores to HBM.
    hT = jnp.transpose(h)                                    # (128, tile_b) f32
    z = jnp.sum(hT * w4_ref[...], axis=0, keepdims=True)     # (1, tile_b)
    z = z + b4_ref[...]
    # sigmoid routes exp/logistic to the EUP slot (no VALU divide)
    o_ref[0] = jax.nn.sigmoid(z).astype(o_ref.dtype)


def prepare_kernel_params(params):
    """Zero-pad every layer to a lane-dense width of 128 and cast the MXU
    weight matrices to bf16.  Call ONCE (e.g. at init) and reuse the result:
    re-preparing per forward call would add ~8 tiny XLA pad/convert launches
    that dominate this small forward."""
    def pad2(a, rows, cols):
        r, c = a.shape
        return jnp.pad(a, ((0, rows - r), (0, cols - c)))

    F = params["w1"].shape[0]
    w1 = pad2(params["w1"], F, HIDDEN).astype(jnp.bfloat16)       # (F, 128)
    b1 = pad2(params["b1"], 1, HIDDEN)                            # (1, 128) f32
    w2 = pad2(params["w2"], HIDDEN, HIDDEN).astype(jnp.bfloat16)  # (128, 128)
    b2 = pad2(params["b2"], 1, HIDDEN)                            # (1, 128) f32
    w3 = pad2(params["w3"], HIDDEN, HIDDEN).astype(jnp.bfloat16)  # (128, 128)
    b3 = pad2(params["b3"], 1, HIDDEN)                            # (1, 128) f32
    # fc4 weight as a (128, 1) f32 column for the sublane-axis reduction.
    w4 = pad2(params["w4"], HIDDEN, 1)                            # (128, 1) f32
    b4 = params["b4"].reshape(1, 1)                               # (1, 1)   f32
    return w1, b1, w2, b2, w3, b3, w4, b4


def _round_up(n, m):
    return ((n + m - 1) // m) * m


def song_classifier_forward(x, prepared, *, tile_b=None):
    """x: (B, F) float32.  prepared: output of prepare_kernel_params (padded
    bf16/f32 weights).  Returns (B, 1) float32 sigmoid probabilities."""
    B, F = x.shape
    w1, b1, w2, b2, w3, b3, w4, b4 = prepared

    if tile_b is None:
        # Single grid step for small/medium batches (no per-step overhead on
        # 1-TC chips, no pointless cross-TC split of a tiny kernel); tile only
        # once B is large enough that parallel steps carry real work.
        tile_b = min(_round_up(B, 128), 2048)
    n_tiles = pl.cdiv(B, tile_b)
    Bp = n_tiles * tile_b
    # Cheap f32 pad of the batch tail only (no wrapper-side bf16 astype).
    xp = x if Bp == B else jnp.pad(x, ((0, Bp - B), (0, 0)))

    def rep(shape):
        # Grid-invariant full-array block: fetched once, resident in VMEM
        # across all grid steps (total weight footprint < 200 KiB).
        return pl.BlockSpec(shape, lambda i: tuple(0 for _ in shape))

    out = pl.pallas_call(
        mlp_kernel,
        # Lane-dense output: batch along the last (lane) axis.
        out_shape=jax.ShapeDtypeStruct((n_tiles, 1, tile_b), jnp.float32),
        grid_spec=pltpu.PrefetchScalarGridSpec(
            num_scalar_prefetch=0,
            grid=(n_tiles,),
            in_specs=[
                pl.BlockSpec((tile_b, F), lambda i: (i, 0)),  # x batch tile (f32)
                rep(w1.shape), rep(b1.shape),
                rep(w2.shape), rep(b2.shape),
                rep(w3.shape), rep(b3.shape),
                rep(w4.shape), rep(b4.shape),
            ],
            out_specs=pl.BlockSpec((1, 1, tile_b), lambda i: (i, 0, 0)),
        ),
        compiler_params=pltpu.CompilerParams(
            dimension_semantics=("arbitrary",) if n_tiles == 1 else ("parallel",)),
    )(xp, w1, b1, w2, b2, w3, b3, w4, b4)

    # (n_tiles, 1, tile_b) lane-dense result back to (B, 1); padded rows dropped.
    return out.reshape(Bp, 1)[:B]


def init_params(key, in_features):
    """Deterministic init mimicking PyTorch's default Linear init
    (uniform(-1/sqrt(fan_in), 1/sqrt(fan_in))).  Natural (unpadded) shapes."""
    dims = [(in_features, 64), (64, 128), (128, 32), (32, 1)]
    params = {}
    keys = jax.random.split(key, 2 * len(dims))
    for li, (fan_in, fan_out) in enumerate(dims, start=1):
        bound = 1.0 / (fan_in ** 0.5)
        kw, kb = keys[2 * (li - 1)], keys[2 * (li - 1) + 1]
        params[f"w{li}"] = jax.random.uniform(
            kw, (fan_in, fan_out), jnp.float32, minval=-bound, maxval=bound)
        params[f"b{li}"] = jax.random.uniform(
            kb, (1, fan_out), jnp.float32, minval=-bound, maxval=bound)
    return params


def reference_forward(x, params):
    h = jnp.maximum(x @ params["w1"] + params["b1"], 0.0)
    h = jnp.maximum(h @ params["w2"] + params["b2"], 0.0)
    h = jnp.maximum(h @ params["w3"] + params["b3"], 0.0)
    return jax.nn.sigmoid(h @ params["w4"] + params["b4"])


if __name__ == "__main__":
    key = jax.random.PRNGKey(0)
    k_in, k_params = jax.random.split(key)

    B, F = 500, 16      # F=16 = X_train_tensor.shape[1]; B=500 exercises the padded tail
    x = jax.random.normal(k_in, (B, F), dtype=jnp.float32)
    params = init_params(k_params, F)

    # Weight prep hoisted out of the per-call path (pad/cast once, reuse).
    prepared = prepare_kernel_params(params)

    fwd = jax.jit(lambda xx: song_classifier_forward(xx, prepared))
    out = jax.block_until_ready(fwd(x))

    ref = reference_forward(x, params)
    assert out.shape == (B, 1)
    # bf16 MXU inputs -> loosened tolerance vs. the pure-f32 reference
    assert jnp.allclose(out, ref, atol=2e-2, rtol=2e-2), "mismatch vs reference"

    print("KERNEL_OK")
</pallas_src>

<mosaic_0001>
module attributes {stable_mosaic.version = 11 : i64} {
  func.func @mlp_kernel(%arg0: i32, %arg1: memref<512x16xf32, #tpu.memory_space<vmem>>, %arg2: memref<16x128xbf16, #tpu.memory_space<vmem>>, %arg3: memref<1x128xf32, #tpu.memory_space<vmem>>, %arg4: memref<128x128xbf16, #tpu.memory_space<vmem>>, %arg5: memref<1x128xf32, #tpu.memory_space<vmem>>, %arg6: memref<128x128xbf16, #tpu.memory_space<vmem>>, %arg7: memref<1x128xf32, #tpu.memory_space<vmem>>, %arg8: memref<128x1xf32, #tpu.memory_space<vmem>>, %arg9: memref<1x1xf32, #tpu.memory_space<vmem>>, %arg10: memref<1x1x512xf32, #tpu.memory_space<vmem>>) attributes {dimension_semantics = [#tpu.dimension_semantics<arbitrary>], iteration_bounds = array<i64: 1>, scalar_prefetch = 0 : i64, scratch_operands = 0 : i64, tpu.core_type = #tpu.core_type<tc>, window_params = [{transform_indices = @transform_0, window_bounds = array<i64: 512, 16>}, {pipeline_mode = #tpu.pipeline_mode<synchronous>, transform_indices = @transform_1, window_bounds = array<i64: 16, 128>}, {pipeline_mode = #tpu.pipeline_mode<synchronous>, transform_indices = @transform_2, window_bounds = array<i64: 1, 128>}, {pipeline_mode = #tpu.pipeline_mode<synchronous>, transform_indices = @transform_3, window_bounds = array<i64: 128, 128>}, {pipeline_mode = #tpu.pipeline_mode<synchronous>, transform_indices = @transform_4, window_bounds = array<i64: 1, 128>}, {pipeline_mode = #tpu.pipeline_mode<synchronous>, transform_indices = @transform_5, window_bounds = array<i64: 128, 128>}, {pipeline_mode = #tpu.pipeline_mode<synchronous>, transform_indices = @transform_6, window_bounds = array<i64: 1, 128>}, {pipeline_mode = #tpu.pipeline_mode<synchronous>, transform_indices = @transform_7, window_bounds = array<i64: 128, 1>}, {pipeline_mode = #tpu.pipeline_mode<synchronous>, transform_indices = @transform_8, window_bounds = array<i64: 1, 1>}, {transform_indices = @transform_9, window_bounds = array<i64: 1, 1, 512>}]} {
    %c0 = arith.constant 0 : index
    %c0_0 = arith.constant 0 : index
    %0 = vector.load %arg1[%c0, %c0_0] : memref<512x16xf32, #tpu.memory_space<vmem>>, vector<512x16xf32>
    %1 = arith.truncf %0 : vector<512x16xf32> to vector<512x16xbf16>
    %c0_1 = arith.constant 0 : index
    %c0_2 = arith.constant 0 : index
    %2 = vector.load %arg2[%c0_1, %c0_2] : memref<16x128xbf16, #tpu.memory_space<vmem>>, vector<16x128xbf16>
    %cst = arith.constant dense<0.000000e+00> : vector<512x128xf32>
    %3 = tpu.matmul %1, %2, %cst {dimension_numbers = #tpu.dot_dimension_numbers<[1], [0], [0], [1], [0, 0, 1, 1], [], []>} : vector<512x16xbf16>, vector<16x128xbf16>, vector<512x128xf32> -> vector<512x128xf32>
    %c0_3 = arith.constant 0 : index
    %c0_4 = arith.constant 0 : index
    %4 = vector.load %arg3[%c0_3, %c0_4] : memref<1x128xf32, #tpu.memory_space<vmem>>, vector<1x128xf32>
    %5 = vector.broadcast %4 : vector<1x128xf32> to vector<512x128xf32>
    %6 = arith.addf %3, %5 : vector<512x128xf32>
    %cst_5 = arith.constant 0.000000e+00 : f32
    %7 = vector.broadcast %cst_5 : f32 to vector<512x128xf32>
    %8 = arith.maximumf %6, %7 : vector<512x128xf32>
    %9 = arith.truncf %8 : vector<512x128xf32> to vector<512x128xbf16>
    %c0_6 = arith.constant 0 : index
    %c0_7 = arith.constant 0 : index
    %10 = vector.load %arg4[%c0_6, %c0_7] : memref<128x128xbf16, #tpu.memory_space<vmem>>, vector<128x128xbf16>
    %cst_8 = arith.constant dense<0.000000e+00> : vector<512x128xf32>
    %11 = tpu.matmul %9, %10, %cst_8 {dimension_numbers = #tpu.dot_dimension_numbers<[1], [0], [0], [1], [0, 0, 1, 1], [], []>} : vector<512x128xbf16>, vector<128x128xbf16>, vector<512x128xf32> -> vector<512x128xf32>
    %c0_9 = arith.constant 0 : index
    %c0_10 = arith.constant 0 : index
    %12 = vector.load %arg5[%c0_9, %c0_10] : memref<1x128xf32, #tpu.memory_space<vmem>>, vector<1x128xf32>
    %13 = vector.broadcast %12 : vector<1x128xf32> to vector<512x128xf32>
    %14 = arith.addf %11, %13 : vector<512x128xf32>
    %cst_11 = arith.constant 0.000000e+00 : f32
    %15 = vector.broadcast %cst_11 : f32 to vector<512x128xf32>
    %16 = arith.maximumf %14, %15 : vector<512x128xf32>
    %17 = arith.truncf %16 : vector<512x128xf32> to vector<512x128xbf16>
    %c0_12 = arith.constant 0 : index
    %c0_13 = arith.constant 0 : index
    %18 = vector.load %arg6[%c0_12, %c0_13] : memref<128x128xbf16, #tpu.memory_space<vmem>>, vector<128x128xbf16>
    %cst_14 = arith.constant dense<0.000000e+00> : vector<512x128xf32>
    %19 = tpu.matmul %17, %18, %cst_14 {dimension_numbers = #tpu.dot_dimension_numbers<[1], [0], [0], [1], [0, 0, 1, 1], [], []>} : vector<512x128xbf16>, vector<128x128xbf16>, vector<512x128xf32> -> vector<512x128xf32>
    %c0_15 = arith.constant 0 : index
    %c0_16 = arith.constant 0 : index
    %20 = vector.load %arg7[%c0_15, %c0_16] : memref<1x128xf32, #tpu.memory_space<vmem>>, vector<1x128xf32>
    %21 = vector.broadcast %20 : vector<1x128xf32> to vector<512x128xf32>
    %22 = arith.addf %19, %21 : vector<512x128xf32>
    %cst_17 = arith.constant 0.000000e+00 : f32
    %23 = vector.broadcast %cst_17 : f32 to vector<512x128xf32>
    %24 = arith.maximumf %22, %23 : vector<512x128xf32>
    %25 = tpu.transpose %24, [1, 0] : vector<512x128xf32> -> vector<128x512xf32>
    %c0_18 = arith.constant 0 : index
    %c0_19 = arith.constant 0 : index
    %26 = vector.load %arg8[%c0_18, %c0_19] : memref<128x1xf32, #tpu.memory_space<vmem>>, vector<128x1xf32>
    %27 = vector.broadcast %26 : vector<128x1xf32> to vector<128x512xf32>
    %28 = arith.mulf %25, %27 : vector<128x512xf32>
    %cst_20 = arith.constant dense<0.000000e+00> : vector<512xf32>
    %29 = vector.multi_reduction <add>, %28, %cst_20 [0] : vector<128x512xf32> to vector<512xf32>
    %30 = vector.shape_cast %29 : vector<512xf32> to vector<1x512xf32>
    %c0_21 = arith.constant 0 : index
    %c0_22 = arith.constant 0 : index
    %31 = vector.load %arg9[%c0_21, %c0_22] : memref<1x1xf32, #tpu.memory_space<vmem>>, vector<1x1xf32>
    %32 = vector.broadcast %31 : vector<1x1xf32> to vector<1x512xf32>
    %33 = arith.addf %30, %32 : vector<1x512xf32>
    %34 = arith.negf %33 : vector<1x512xf32>
    %35 = math.exp %34 : vector<1x512xf32>
    %cst_23 = arith.constant 1.000000e+00 : f32
    %36 = vector.broadcast %cst_23 : f32 to vector<1x512xf32>
    %37 = arith.addf %36, %35 : vector<1x512xf32>
    %38 = arith.divf %36, %37 : vector<1x512xf32>
    %c0_24 = arith.constant 0 : index
    %c0_25 = arith.constant 0 : index
    %c0_26 = arith.constant 0 : index
    %39 = vector.load %arg10[%c0_24, %c0_25, %c0_26] : memref<1x1x512xf32, #tpu.memory_space<vmem>>, vector<1x1x512xf32>
    %40 = vector.shape_cast %39 : vector<1x1x512xf32> to vector<1x512xf32>
    %41 = vector.shape_cast %38 : vector<1x512xf32> to vector<1x1x512xf32>
    tpu.vector_store %arg10[%c0_24, %c0_25, %c0_26], %41 {strides = array<i32>} : memref<1x1x512xf32, #tpu.memory_space<vmem>>, vector<1x1x512xf32>,
    return
  }
  func.func @transform_0(%arg0: i32) -> (i32, i32) {
    %c0_i32 = arith.constant 0 : i32
    %c0_i32_0 = arith.constant 0 : i32
    return %arg0, %c0_i32 : i32, i32
  }
  func.func @transform_1(%arg0: i32) -> (i32, i32) {
    %c0_i32 = arith.constant 0 : i32
    %c0_i32_0 = arith.constant 0 : i32
    %c0_i32_1 = arith.constant 0 : i32
    return %c0_i32, %c0_i32_0 : i32, i32
  }
  func.func @transform_2(%arg0: i32) -> (i32, i32) {
    %c0_i32 = arith.constant 0 : i32
    %c0_i32_0 = arith.constant 0 : i32
    %c0_i32_1 = arith.constant 0 : i32
    return %c0_i32, %c0_i32_0 : i32, i32
  }
  func.func @transform_3(%arg0: i32) -> (i32, i32) {
    %c0_i32 = arith.constant 0 : i32
    %c0_i32_0 = arith.constant 0 : i32
    %c0_i32_1 = arith.constant 0 : i32
    return %c0_i32, %c0_i32_0 : i32, i32
  }
  func.func @transform_4(%arg0: i32) -> (i32, i32) {
    %c0_i32 = arith.constant 0 : i32
    %c0_i32_0 = arith.constant 0 : i32
    %c0_i32_1 = arith.constant 0 : i32
    return %c0_i32, %c0_i32_0 : i32, i32
  }
  func.func @transform_5(%arg0: i32) -> (i32, i32) {
    %c0_i32 = arith.constant 0 : i32
    %c0_i32_0 = arith.constant 0 : i32
    %c0_i32_1 = arith.constant 0 : i32
    return %c0_i32, %c0_i32_0 : i32, i32
  }
  func.func @transform_6(%arg0: i32) -> (i32, i32) {
    %c0_i32 = arith.constant 0 : i32
    %c0_i32_0 = arith.constant 0 : i32
    %c0_i32_1 = arith.constant 0 : i32
    return %c0_i32, %c0_i32_0 : i32, i32
  }
  func.func @transform_7(%arg0: i32) -> (i32, i32) {
    %c0_i32 = arith.constant 0 : i32
    %c0_i32_0 = arith.constant 0 : i32
    %c0_i32_1 = arith.constant 0 : i32
    return %c0_i32, %c0_i32_0 : i32, i32
  }
  func.func @transform_8(%arg0: i32) -> (i32, i32) {
    %c0_i32 = arith.constant 0 : i32
    %c0_i32_0 = arith.constant 0 : i32
    %c0_i32_1 = arith.constant 0 : i32
    return %c0_i32, %c0_i32_0 : i32, i32
  }
  func.func @transform_9(%arg0: i32) -> (i32, i32, i32) {
    %c0_i32 = arith.constant 0 : i32
    %c0_i32_0 = arith.constant 0 : i32
    %c0_i32_1 = arith.constant 0 : i32
    return %arg0, %c0_i32, %c0_i32_0 : i32, i32, i32
  }
}

</mosaic_0001>

<bundles_post_ra>
// kernel: _lambda_.1
= control target key start
LH: loop header
LB: loop body
LE: loop exit
PB: predicated region body
PF: predicated region fallthrough
CT: control target
= control target key end

     0   :  { %vm146_vm0 = vcmask 130048   ;;  %s3155_s1 = inlined_call_operand.vmem [shape: bf16[16,128], index: 1, kind: input, shape index: {}]   ;;  %s3156_s0 = inlined_call_operand.vmem [shape: f32[512,16], index: 0, kind: input, shape index: {}]   ;;  %s3157_s3 = inlined_call_operand.vmem [shape: bf16[128,128], index: 3, kind: input, shape index: {}]   ;;  %s3158_s2 = inlined_call_operand.vmem [shape: f32[1,128], index: 2, kind: input, shape index: {}]   ;;  %s3159_s5 = inlined_call_operand.vmem [shape: bf16[128,128], index: 5, kind: input, shape index: {}]   ;;  %s3160_s4 = inlined_call_operand.vmem [shape: f32[1,128], index: 4, kind: input, shape index: {}]   ;;  %s3161_s7 = inlined_call_operand.vmem [shape: f32[128,1], index: 7, kind: input, shape index: {}]   ;;  %s3162_s6 = inlined_call_operand.vmem [shape: f32[1,128], index: 6, kind: input, shape index: {}]   ;;  %s3163_s8 = inlined_call_operand.<no memory space> [shape: f32[1,1], index: 8, kind: input, shape index: {}]   ;;  %s3164_s9 = inlined_call_operand.vmem [shape: f32[1,1,512], index: 9, kind: output, shape index: {}]  }
   0x1   :  { %v2357_v0 = vld [vmem:[%s3155_s1] sm:$0xff]   ;;  %v36_v2 = vld [vmem:[%s3156_s0 + $0x8] sm:$0xff]  ;;  %v37_v3 = vld [vmem:[%s3156_s0 + $0x10] sm:$0xff] }
   0x2   :  { %v35_v1 = vld [vmem:[%s3156_s0] sm:$0xff]  ;;  %2125 = vmatprep.subr.bf16.mxu0 %v2357_v0  ;;  %v38_v5 = vld [vmem:[%s3156_s0 + $0x18] sm:$0xff]  ;;  %v40_v7 = vld [vmem:[%s3156_s0 + $0x28] sm:$0xff]  ;;  %2351 = vmatprep.subr.bf16.mxu1 %v2357_v0 }
   0x3   :  { %v99_v4 = vpack.c.bf16 %v36_v2, %v35_v1  ;;  %v39_v6 = vld [vmem:[%s3156_s0 + $0x20] sm:$0xff]  ;;  %2126 = vmatpush3.bf16.msra.mxu0 %v2357_v0  ;;  %v100_v8 = vpack.c.bf16 %v38_v5, %v37_v3  ;;  %2352 = vmatpush3.bf16.msra.mxu1 %v2357_v0  ;;  %v41_v10 = vld [vmem:[%s3156_s0 + $0x30] sm:$0xff]  ;;  %v42_v11 = vld [vmem:[%s3156_s0 + $0x38] sm:$0xff] }
   0x4   :  { %v101_v9 = vpack.c.bf16 %v40_v7, %v39_v6  ;;  %v43_v12 = vld [vmem:[%s3156_s0 + $0x40] sm:$0xff]  ;;  %v44_v13 = vld [vmem:[%s3156_s0 + $0x48] sm:$0xff]  ;;  %v102_v14 = vpack.c.bf16 %v42_v11, %v41_v10  ;;  %v69_v18 = vld [vmem:[%s3156_s0 + $0x110] sm:$0xff] }
   0x5   :  { %2127 = vmatprep.mubr.msk.bf16.mxu0 %vm146_vm0, %v99_v4  ;;  %v103_v15 = vpack.c.bf16 %v44_v13, %v43_v12  ;;  %v67_v16 = vld [vmem:[%s3156_s0 + $0x100] sm:$0xff]  ;;  %v68_v17 = vld [vmem:[%s3156_s0 + $0x108] sm:$0xff]  ;;  %v70_v19 = vld [vmem:[%s3156_s0 + $0x118] sm:$0xff] }
   0x6   :  { %2128 = vmatmul.mubr.msk.bf16.vlgmr.msra.gmra.mxu0 %vm146_vm0, %v100_v8  ;;  %v115_v20 = vpack.c.bf16 %v68_v17, %v67_v16  ;;  %v116_v21 = vpack.c.bf16 %v70_v19, %v69_v18  ;;  %v71_v22 = vld [vmem:[%s3156_s0 + $0x120] sm:$0xff]  ;;  %v72_v23 = vld [vmem:[%s3156_s0 + $0x128] sm:$0xff]  ;;  %v45_v25 = vld [vmem:[%s3156_s0 + $0x50] sm:$0xff] }
   0x7   :  { %2131 = vmatprep.mubr.msk.bf16.mxu0 %vm146_vm0, %v101_v9  ;;  %v117_v24 = vpack.c.bf16 %v72_v23, %v71_v22  ;;  %v46_v26 = vld [vmem:[%s3156_s0 + $0x58] sm:$0xff]  ;;  %v47_v27 = vld [vmem:[%s3156_s0 + $0x60] sm:$0xff]  ;;  %v48_v28 = vld [vmem:[%s3156_s0 + $0x68] sm:$0xff] }
   0x8   :  { %2159 = vmatprep.mubr.msk.bf16.mxu1 %vm146_vm0, %v115_v20  ;;  %v73_v29 = vld [vmem:[%s3156_s0 + $0x130] sm:$0xff]  ;;  %v74_v30 = vld [vmem:[%s3156_s0 + $0x138] sm:$0xff]  ;;  %v104_v31 = vpack.c.bf16 %v46_v26, %v45_v25  ;;  %v75_v32 = vld [vmem:[%s3156_s0 + $0x140] sm:$0xff]  ;;  %v105_v34 = vpack.c.bf16 %v48_v28, %v47_v27 }
   0x9   :  { %2160 = vmatmul.mubr.msk.bf16.vlgmr.msra.gmra.mxu1 %vm146_vm0, %v116_v21  ;;  %v76_v33 = vld [vmem:[%s3156_s0 + $0x148] sm:$0xff]  ;;  %v118_v35 = vpack.c.bf16 %v74_v30, %v73_v29  ;;  %v49_v36 = vld [vmem:[%s3156_s0 + $0x70] sm:$0xff]  ;;  %v50_v37 = vld [vmem:[%s3156_s0 + $0x78] sm:$0xff] }
   0xa   :  { %2163 = vmatprep.mubr.msk.bf16.mxu1 %vm146_vm0, %v117_v24  ;;  %v119_v38 = vpack.c.bf16 %v76_v33, %v75_v32  ;;  %v51_v39 = vld [vmem:[%s3156_s0 + $0x80] sm:$0xff]  ;;  %v52_v40 = vld [vmem:[%s3156_s0 + $0x88] sm:$0xff]  ;;  %v77_v41 = vld [vmem:[%s3156_s0 + $0x150] sm:$0xff]  ;;  %v106_v46 = vpack.c.bf16 %v50_v37, %v49_v36 }
   0xb   :  { %v78_v42 = vld [vmem:[%s3156_s0 + $0x158] sm:$0xff]  ;;  %v2359_v44 = vld [vmem:[%s3157_s3 + $0x30] sm:$0xff]   ;;  %v79_v45 = vld [vmem:[%s3156_s0 + $0x160] sm:$0xff]  ;;  %v107_v48 = vpack.c.bf16 %v52_v40, %v51_v39 }
   0xc   :  { %v2358_v43 = vld [vmem:[%s3157_s3 + $0x38] sm:$0xff]   ;;  %v80_v47 = vld [vmem:[%s3156_s0 + $0x168] sm:$0xff]  ;;  %v120_v50 = vpack.c.bf16 %v78_v42, %v77_v41  ;;  %v53_v52 = vld [vmem:[%s3156_s0 + $0x90] sm:$0xff] }
   0xd   :  { %2191 = vmatprep.subr.bf16.mxu1 %v2358_v43  ;;  %v2360_v49 = vld [vmem:[%s3157_s3 + $0x28] sm:$0xff]   ;;  %v121_v51 = vpack.c.bf16 %v80_v47, %v79_v45  ;;  %v54_v53 = vld [vmem:[%s3156_s0 + $0x98] sm:$0xff]  ;;  %v2361_v54 = vld [vmem:[%s3157_s3 + $0x20] sm:$0xff]  }
   0xe   :  { %2132 = vmatmul.mubr.msk.bf16.gmra.mxu0 %vm146_vm0, %v102_v14  ;;  %2192 = vmatpush3.bf16.msra.mxu1 %v2358_v43  ;;  %v55_v55 = vld [vmem:[%s3156_s0 + $0xa0] sm:$0xff]  ;;  %v56_v56 = vld [vmem:[%s3156_s0 + $0xa8] sm:$0xff]  ;;  %v81_v57 = vld [vmem:[%s3156_s0 + $0x170] sm:$0xff]  ;;  %v108_v59 = vpack.c.bf16 %v54_v53, %v53_v52 }
   0xf   :  { %2135 = vmatprep.mubr.msk.bf16.mxu0 %vm146_vm0, %v103_v15  ;;  %2193 = vmatprep.subr.bf16.mxu1 %v2359_v44  ;;  %v82_v58 = vld [vmem:[%s3156_s0 + $0x178] sm:$0xff]  ;;  %v83_v60 = vld [vmem:[%s3156_s0 + $0x180] sm:$0xff]  ;;  %v84_v61 = vld [vmem:[%s3156_s0 + $0x188] sm:$0xff]  ;;  %v109_v62 = vpack.c.bf16 %v56_v56, %v55_v55 }
  0x10   :  { %v2362_v63 = vld [vmem:[%s3157_s3 + $0x18] sm:$0xff]   ;;  %v122_v0 = vpack.c.bf16 %v82_v58, %v81_v57  ;;  %v123_v1 = vpack.c.bf16 %v84_v61, %v83_v60  ;;  %v57_v2 = vld [vmem:[%s3156_s0 + $0xb0] sm:$0xff]  ;;  %v59_v5 = vld [vmem:[%s3156_s0 + $0xc0] sm:$0xff] }
  0x11   :  { %2164 = vmatmul.mubr.msk.bf16.gmra.mxu1 %vm146_vm0, %v118_v35  ;;  %v58_v3 = vld [vmem:[%s3156_s0 + $0xb8] sm:$0xff]  ;;  %v2363_v4 = vld [vmem:[%s3157_s3 + $0x10] sm:$0xff]   ;;  %v60_v6 = vld [vmem:[%s3156_s0 + $0xc8] sm:$0xff] }
  0x12   :  { %2167 = vmatprep.mubr.msk.bf16.mxu1 %vm146_vm0, %v119_v38  ;;  %2194 = vmatpush3.bf16.msra.mxu1 %v2359_v44  ;;  %v85_v7 = vld [vmem:[%s3156_s0 + $0x190] sm:$0xff]  ;;  %v86_v8 = vld [vmem:[%s3156_s0 + $0x198] sm:$0xff]  ;;  %v110_v9 = vpack.c.bf16 %v58_v3, %v57_v2  ;;  %v87_v10 = vld [vmem:[%s3156_s0 + $0x1a0] sm:$0xff]  ;;  %v111_v12 = vpack.c.bf16 %v60_v6, %v59_v5 }
  0x13   :  { %2195 = vmatprep.subr.bf16.mxu1 %v2360_v49  ;;  %v88_v11 = vld [vmem:[%s3156_s0 + $0x1a8] sm:$0xff]  ;;  %v124_v14 = vpack.c.bf16 %v86_v8, %v85_v7  ;;  %v61_v16 = vld [vmem:[%s3156_s0 + $0xd0] sm:$0xff]  ;;  %v62_v17 = vld [vmem:[%s3156_s0 + $0xd8] sm:$0xff] }
  0x14   :  { %v2364_v13 = vld [vmem:[%s3157_s3 + $0x8] sm:$0xff]   ;;  %v125_v15 = vpack.c.bf16 %v88_v11, %v87_v10  ;;  %v63_v18 = vld [vmem:[%s3156_s0 + $0xe0] sm:$0xff]  ;;  %v89_v20 = vld [vmem:[%s3156_s0 + $0x1b0] sm:$0xff]  ;;  %v112_v22 = vpack.c.bf16 %v62_v17, %v61_v16 }
  0x15   :  { %v64_v19 = vld [vmem:[%s3156_s0 + $0xe8] sm:$0xff]  ;;  %v90_v21 = vld [vmem:[%s3156_s0 + $0x1b8] sm:$0xff]  ;;  %v91_v23 = vld [vmem:[%s3156_s0 + $0x1c0] sm:$0xff] }
  0x16   :  { %2136 = vmatmul.mubr.msk.bf16.gmra.mxu0 %vm146_vm0, %v104_v31  ;;  %2196 = vmatpush3.bf16.msra.mxu1 %v2360_v49  ;;  %v92_v24 = vld [vmem:[%s3156_s0 + $0x1c8] sm:$0xff]  ;;  %v113_v25 = vpack.c.bf16 %v64_v19, %v63_v18  ;;  %v126_v26 = vpack.c.bf16 %v90_v21, %v89_v20  ;;  %v65_v28 = vld [vmem:[%s3156_s0 + $0xf0] sm:$0xff]  ;;  %v66_v29 = vld [vmem:[%s3156_s0 + $0xf8] sm:$0xff] }
  0x17   :  { %2139 = vmatprep.mubr.msk.bf16.mxu0 %vm146_vm0, %v105_v34  ;;  %2197 = vmatprep.subr.bf16.mxu1 %v2361_v54  ;;  %v127_v27 = vpack.c.bf16 %v92_v24, %v91_v23  ;;  %v93_v30 = vld [vmem:[%s3156_s0 + $0x1d0] sm:$0xff]  ;;  %v94_v31 = vld [vmem:[%s3156_s0 + $0x1d8] sm:$0xff]  ;;  %v114_v32 = vpack.c.bf16 %v66_v29, %v65_v28  ;;  %v95_v33 = vld [vmem:[%s3156_s0 + $0x1e0] sm:$0xff] }
  0x18   :  { %v96_v34 = vld [vmem:[%s3156_s0 + $0x1e8] sm:$0xff]  ;;  %v128_v35 = vpack.c.bf16 %v94_v31, %v93_v30  ;;  %v97_v37 = vld [vmem:[%s3156_s0 + $0x1f0] sm:$0xff]  ;;  %v98_v38 = vld [vmem:[%s3156_s0 + $0x1f8] sm:$0xff] }
  0x19   :  { %2168 = vmatmul.mubr.msk.bf16.gmra.mxu1 %vm146_vm0, %v120_v50  ;;  %v129_v36 = vpack.c.bf16 %v96_v34, %v95_v33  ;;  %v130_v39 = vpack.c.bf16 %v98_v38, %v97_v37  ;;  %v2365_v40 = vld [vmem:[%s3157_s3] sm:$0xff]   ;;  %v2366_v50 = vld [vmem:[%s3159_s5 + $0x38] sm:$0xff]   ;;  %v2367_v53 = vld [vmem:[%s3159_s5 + $0x30] sm:$0xff]  }
  0x1a   :  { %2171 = vmatprep.mubr.msk.bf16.mxu1 %vm146_vm0, %v121_v51  ;;  %2198 = vmatpush3.bf16.msra.mxu1 %v2361_v54  ;;  %v2696_v43 = vld [vmem:[%s3158_s2] ss:$0 sm:$0xff]  ;;  %v2368_v60 = vld [vmem:[%s3159_s5 + $0x28] sm:$0xff]   ;;  %v2370_v16 = vld [vmem:[%s3159_s5 + $0x18] sm:$0xff]  }
  0x1b   :  { %2199 = vmatprep.subr.bf16.mxu1 %v2362_v63  ;;  %2271 = vmatprep.subr.bf16.mxu0 %v2366_v50  ;;  %v2369_v6 = vld [vmem:[%s3159_s5 + $0x20] sm:$0xff]  }
  0x1c   :  { %2272 = vmatpush3.bf16.msra.mxu0 %v2366_v50 }
  0x1d   :  { %2273 = vmatprep.subr.bf16.mxu0 %v2367_v53 }
  0x1e   :  { %2140 = vmatmul.mubr.msk.bf16.gmra.mxu0 %vm146_vm0, %v106_v46  ;;  %2200 = vmatpush3.bf16.msra.mxu1 %v2362_v63 }
  0x1f   :  { %2143 = vmatprep.mubr.msk.bf16.mxu0 %vm146_vm0, %v107_v48  ;;  %2201 = vmatprep.subr.bf16.mxu1 %v2363_v4 }
  0x20   :  { %2274 = vmatpush3.bf16.msra.mxu0 %v2367_v53 }
  0x21   :  { %2172 = vmatmul.mubr.msk.bf16.gmra.mxu1 %vm146_vm0, %v122_v0  ;;  %2275 = vmatprep.subr.bf16.mxu0 %v2368_v60 }
  0x22   :  { %2175 = vmatprep.mubr.msk.bf16.mxu1 %vm146_vm0, %v123_v1  ;;  %2202 = vmatpush3.bf16.msra.mxu1 %v2363_v4 }
  0x23   :  { %2203 = vmatprep.subr.bf16.mxu1 %v2364_v13 }
  0x24   :  { %2276 = vmatpush3.bf16.msra.mxu0 %v2368_v60 }
  0x25   :  { %2277 = vmatprep.subr.bf16.mxu0 %v2369_v6 }
  0x26   :  { %2144 = vmatmul.mubr.msk.bf16.gmra.mxu0 %vm146_vm0, %v108_v59  ;;  %2204 = vmatpush3.bf16.msra.mxu1 %v2364_v13 }
  0x27   :  { %2147 = vmatprep.mubr.msk.bf16.mxu0 %vm146_vm0, %v109_v62  ;;  %2205 = vmatprep.subr.bf16.mxu1 %v2365_v40 }
  0x28   :  { %2278 = vmatpush3.bf16.msra.mxu0 %v2369_v6 }
  0x29   :  { %2176 = vmatmul.mubr.msk.bf16.gmra.mxu1 %vm146_vm0, %v124_v14  ;;  %2279 = vmatprep.subr.bf16.mxu0 %v2370_v16 }
  0x2a   :  { %2179 = vmatprep.mubr.msk.bf16.mxu1 %vm146_vm0, %v125_v15  ;;  %2206 = vmatpush3.bf16.msra.mxu1 %v2365_v40 }
  0x2c   :  { %2280 = vmatpush3.bf16.msra.mxu0 %v2370_v16 }
  0x2e   :  { %2148 = vmatmul.mubr.msk.bf16.gmra.mxu0 %vm146_vm0, %v110_v9 }
  0x2f   :  { %2151 = vmatprep.mubr.msk.bf16.mxu0 %vm146_vm0, %v111_v12 }
  0x31   :  { %2180 = vmatmul.mubr.msk.bf16.gmra.mxu1 %vm146_vm0, %v126_v26  ;;  %v2371_v26 = vld [vmem:[%s3159_s5 + $0x10] sm:$0xff]  }
  0x32   :  { %2183 = vmatprep.mubr.msk.bf16.mxu1 %vm146_vm0, %v127_v27  ;;  %2281 = vmatprep.subr.bf16.mxu0 %v2371_v26 }
  0x33   :  { %2282 = vmatpush3.bf16.msra.mxu0 %v2371_v26 }
  0x36   :  { %2152 = vmatmul.mubr.msk.bf16.gmra.mxu0 %vm146_vm0, %v112_v22 }
  0x37   :  { %2155 = vmatprep.mubr.msk.bf16.mxu0 %vm146_vm0, %v113_v25 }
  0x39   :  { %2184 = vmatmul.mubr.msk.bf16.gmra.mxu1 %vm146_vm0, %v128_v35 }
  0x3a   :  { %2187 = vmatprep.mubr.msk.bf16.mxu1 %vm146_vm0, %v129_v36  ;;  %v2372_v36 = vld [vmem:[%s3159_s5 + $0x8] sm:$0xff]  }
  0x3b   :  { %2283 = vmatprep.subr.bf16.mxu0 %v2372_v36 }
  0x3c   :  { %2284 = vmatpush3.bf16.msra.mxu0 %v2372_v36 }
  0x3e   :  { %2156 = vmatmul.mubr.msk.bf16.gmra.mxu0 %vm146_vm0, %v114_v32 }
  0x41   :  { %2188 = vmatmul.mubr.msk.bf16.gmra.mxu1 %vm146_vm0, %v130_v39 }
  0xc6   :  { %v2129_v41 = vpop.f32.mrf.mxu0 }
  0xc7   :  { %v286_v47 = vadd.f32 %v2129_v41, %v2696_v43 }
  0xc8   :  { %v277_v42 = vpop.f32.mrf.mxu0 }
  0xc9   :  { %v278_v45 = vadd.f32 %v2696_v43, %v277_v42  ;;  %v534_v56 = vmax.f32 %v286_v47, 0.0  ;;  %v2708_v58 = vpop.f32.mrf.mxu1 }
  0xca   :  { %v2130_v44 = vpop.f32.mrf.mxu0 }
  0xcb   :  { %v289_v46 = vadd.f32 %v2130_v44, %v2696_v43  ;;  %v532_v54 = vmax.f32 %v278_v45, 0.0  ;;  %v2713_v63 = vpop.f32.mrf.mxu1 }
  0xcc   :  { %v280_v48 = vpop.f32.mrf.mxu0 }
  0xcd   :  { %v281_v49 = vadd.f32 %v2696_v43, %v280_v48  ;;  %v535_v51 = vmax.f32 %v289_v46, 0.0  ;;  %v2718_v4 = vpop.f32.mrf.mxu1 }
  0xce   :  { %v2133_v52 = vpop.f32.mrf.mxu0 }
  0xcf   :  { %v533_v55 = vmax.f32 %v281_v49, 0.0  ;;  %v597_v61 = vpack.c.bf16 %v535_v51, %v534_v56  ;;  %v302_v2 = vadd.f32 %v2133_v52, %v2696_v43  ;;  %v2724_v9 = vpop.f32.mrf.mxu1 }
  0xd0   :  { %v293_v57 = vpop.f32.mrf.mxu0 }
  0xd1   :  { %v596_v59 = vpack.c.bf16 %v533_v55, %v532_v54  ;;  %v294_v0 = vadd.f32 %v2696_v43, %v293_v57  ;;  %v538_v12 = vmax.f32 %v302_v2, 0.0  ;;  %v2726_v14 = vpop.f32.mrf.mxu1 }
  0xd2   :  { %v2134_v62 = vpop.f32.mrf.mxu0 }
  0xd3   :  { %v305_v1 = vadd.f32 %v2134_v62, %v2696_v43  ;;  %2207 = vmatprep.mubr.bf16.mxu1 %v596_v59  ;;  %v536_v10 = vmax.f32 %v294_v0, 0.0  ;;  %v2731_v19 = vpop.f32.mrf.mxu1 }
  0xd4   :  { %v296_v3 = vpop.f32.mrf.mxu0  ;;  %2208 = vmatmul.mubr.bf16.vlgmr.msra.gmra.mxu1 %v597_v61 }
  0xd5   :  { %v297_v5 = vadd.f32 %v2696_v43, %v296_v3  ;;  %v539_v7 = vmax.f32 %v305_v1, 0.0  ;;  %v2736_v24 = vpop.f32.mrf.mxu1 }
  0xd6   :  { %v2137_v8 = vpop.f32.mrf.mxu0 }
  0xd7   :  { %v537_v11 = vmax.f32 %v297_v5, 0.0  ;;  %v599_v17 = vpack.c.bf16 %v539_v7, %v538_v12  ;;  %v318_v22 = vadd.f32 %v2137_v8, %v2696_v43  ;;  %v2742_v29 = vpop.f32.mrf.mxu1 }
  0xd8   :  { %v309_v13 = vpop.f32.mrf.mxu0 }
  0xd9   :  { %v598_v15 = vpack.c.bf16 %v537_v11, %v536_v10  ;;  %v310_v20 = vadd.f32 %v2696_v43, %v309_v13  ;;  %v542_v32 = vmax.f32 %v318_v22, 0.0  ;;  %v2744_v34 = vpop.f32.mrf.mxu1 }
  0xda   :  { %v2138_v18 = vpop.f32.mrf.mxu0 }
  0xdb   :  { %v321_v21 = vadd.f32 %v2138_v18, %v2696_v43  ;;  %2211 = vmatprep.mubr.bf16.mxu1 %v598_v15  ;;  %v540_v30 = vmax.f32 %v310_v20, 0.0  ;;  %v2749_v39 = vpop.f32.mrf.mxu1 }
  0xdc   :  { %v312_v23 = vpop.f32.mrf.mxu0  ;;  %2212 = vmatmul.mubr.bf16.gmra.mxu1 %v599_v17 }
  0xdd   :  { %v313_v25 = vadd.f32 %v2696_v43, %v312_v23  ;;  %v543_v27 = vmax.f32 %v321_v21, 0.0  ;;  %v2755_v48 = vpop.f32.mrf.mxu1 }
  0xde   :  { %v2141_v28 = vpop.f32.mrf.mxu0 }
  0xdf   :  { %v541_v31 = vmax.f32 %v313_v25, 0.0  ;;  %v601_v37 = vpack.c.bf16 %v543_v27, %v542_v32  ;;  %v334_v42 = vadd.f32 %v2141_v28, %v2696_v43  ;;  %v2757_v56 = vpop.f32.mrf.mxu1 }
  0xe0   :  { %v325_v33 = vpop.f32.mrf.mxu0 }
  0xe1   :  { %v600_v35 = vpack.c.bf16 %v541_v31, %v540_v30  ;;  %v326_v40 = vadd.f32 %v2696_v43, %v325_v33  ;;  %v546_v51 = vmax.f32 %v334_v42, 0.0  ;;  %v2763_v2 = vpop.f32.mrf.mxu1 }
  0xe2   :  { %v2142_v38 = vpop.f32.mrf.mxu0 }
  0xe3   :  { %v337_v41 = vadd.f32 %v2142_v38, %v2696_v43  ;;  %2215 = vmatprep.mubr.bf16.mxu1 %v600_v35  ;;  %v544_v49 = vmax.f32 %v326_v40, 0.0  ;;  %v2765_v12 = vpop.f32.mrf.mxu1 }
  0xe4   :  { %v328_v44 = vpop.f32.mrf.mxu0  ;;  %2216 = vmatmul.mubr.bf16.gmra.mxu1 %v601_v37 }
  0xe5   :  { %v329_v45 = vadd.f32 %v2696_v43, %v328_v44  ;;  %v547_v46 = vmax.f32 %v337_v41, 0.0  ;;  %v2771_v22 = vpop.f32.mrf.mxu1 }
  0xe6   :  { %v2145_v47 = vpop.f32.mrf.mxu0 }
  0xe7   :  { %v545_v50 = vmax.f32 %v329_v45, 0.0  ;;  %v603_v54 = vpack.c.bf16 %v547_v46, %v546_v51  ;;  %v350_v60 = vadd.f32 %v2145_v47, %v2696_v43  ;;  %v2773_v32 = vpop.f32.mrf.mxu1  ;;  %v409_v51 = vadd.f32 %v2696_v43, %v2724_v9 }
  0xe8   :  { %v341_v52 = vpop.f32.mrf.mxu0 }
  0xe9   :  { %v602_v53 = vpack.c.bf16 %v545_v50, %v544_v49  ;;  %v342_v57 = vadd.f32 %v2696_v43, %v341_v52  ;;  %v550_v6 = vmax.f32 %v350_v60, 0.0  ;;  %v2779_v42 = vpop.f32.mrf.mxu1  ;;  %v406_v50 = vadd.f32 %v2696_v43, %v2713_v63 }
  0xea   :  { %v2146_v55 = vpop.f32.mrf.mxu0  ;;  %v565_v63 = vmax.f32 %v409_v51, 0.0  ;;  %v465_v51 = vadd.f32 %v2771_v22, %v2696_v43 }
  0xeb   :  { %v353_v59 = vadd.f32 %v2146_v55, %v2696_v43  ;;  %2219 = vmatprep.mubr.bf16.mxu1 %v602_v53  ;;  %v548_v3 = vmax.f32 %v342_v57, 0.0 }
  0xec   :  { %v344_v61 = vpop.f32.mrf.mxu0  ;;  %2220 = vmatmul.mubr.bf16.gmra.mxu1 %v603_v54  ;;  %v2785_v54 = vpop.f32.mrf.mxu1 }
  0xed   :  { %v345_v62 = vadd.f32 %v2696_v43, %v344_v61  ;;  %v551_v0 = vmax.f32 %v353_v59, 0.0  ;;  %v564_v61 = vmax.f32 %v406_v50, 0.0  ;;  %v462_v50 = vadd.f32 %v2763_v2, %v2696_v43 }
  0xee   :  { %v2149_v1 = vpop.f32.mrf.mxu0  ;;  %v478_v2 = vadd.f32 %v2779_v42, %v2696_v43 }
  0xef   :  { %v549_v5 = vmax.f32 %v345_v62, 0.0  ;;  %v605_v10 = vpack.c.bf16 %v551_v0, %v550_v6  ;;  %v366_v16 = vadd.f32 %v2149_v1, %v2696_v43  ;;  %v2791_v1 = vpop.f32.mrf.mxu1 }
  0xf0   :  { %v357_v7 = vpop.f32.mrf.mxu0  ;;  %v481_v22 = vadd.f32 %v2791_v1, %v2696_v43 }
  0xf1   :  { %v604_v8 = vpack.c.bf16 %v549_v5, %v548_v3  ;;  %v358_v13 = vadd.f32 %v2696_v43, %v357_v7  ;;  %v554_v26 = vmax.f32 %v366_v16, 0.0  ;;  %v612_v7 = vpack.c.bf16 %v565_v63, %v564_v61  ;;  %v472_v16 = vpop.f32.mrf.mxu1 }
  0xf2   :  { %v2150_v11 = vpop.f32.mrf.mxu0 }
  0xf3   :  { %v369_v15 = vadd.f32 %v2150_v11, %v2696_v43  ;;  %2223 = vmatprep.mubr.bf16.mxu1 %v604_v8  ;;  %v552_v23 = vmax.f32 %v358_v13, 0.0  ;;  %v422_v8 = vadd.f32 %v2696_v43, %v2731_v19  ;;  %v414_v11 = vadd.f32 %v2708_v58, %v2696_v43 }
  0xf4   :  { %v360_v17 = vpop.f32.mrf.mxu0  ;;  %2224 = vmatmul.mubr.bf16.gmra.mxu1 %v605_v10  ;;  %v425_v10 = vadd.f32 %v2696_v43, %v2742_v29  ;;  %v438_v29 = vadd.f32 %v2696_v43, %v2749_v39  ;;  %v441_v58 = vadd.f32 %v2696_v43, %v2757_v56  ;;  %v454_v39 = vadd.f32 %v2696_v43, %v2765_v12 }
  0xf5   :  { %v361_v18 = vadd.f32 %v2696_v43, %v360_v17  ;;  %v555_v20 = vmax.f32 %v369_v15, 0.0  ;;  %v417_v15 = vadd.f32 %v2718_v4, %v2696_v43  ;;  %v2801_v17 = vpop.f32.mrf.mxu1  ;;  %v430_v4 = vadd.f32 %v2726_v14, %v2696_v43 }
  0xf6   :  { %v2153_v21 = vpop.f32.mrf.mxu0  ;;  %v457_v56 = vadd.f32 %v2696_v43, %v2773_v32  ;;  %v446_v14 = vadd.f32 %v2744_v34, %v2696_v43  ;;  %v470_v34 = vadd.f32 %v2696_v43, %v2785_v54 }
  0xf7   :  { %v553_v25 = vmax.f32 %v361_v18, 0.0  ;;  %v607_v30 = vpack.c.bf16 %v555_v20, %v554_v26  ;;  %v382_v36 = vadd.f32 %v2153_v21, %v2696_v43  ;;  %v568_v18 = vmax.f32 %v422_v8, 0.0 }
  0xf8   :  { %v373_v27 = vpop.f32.mrf.mxu0  ;;  %v569_v20 = vmax.f32 %v425_v10, 0.0  ;;  %v566_v21 = vmax.f32 %v414_v11, 0.0  ;;  %v567_v19 = vmax.f32 %v417_v15, 0.0  ;;  %v574_v12 = vmax.f32 %v446_v14, 0.0 }
  0xf9   :  { %v606_v28 = vpack.c.bf16 %v553_v25, %v552_v23  ;;  %v374_v33 = vadd.f32 %v2696_v43, %v373_v27  ;;  %v558_v46 = vmax.f32 %v382_v36, 0.0  ;;  %v485_v23 = vpop.f32.mrf.mxu1  ;;  %v433_v27 = vadd.f32 %v2736_v24, %v2696_v43 }
  0xfa   :  { %v2154_v31 = vpop.f32.mrf.mxu0  ;;  %v614_v25 = vpack.c.bf16 %v569_v20, %v568_v18  ;;  %v613_v26 = vpack.c.bf16 %v567_v19, %v566_v21  ;;  %v449_v24 = vadd.f32 %v2755_v48, %v2696_v43  ;;  %v473_v48 = vadd.f32 %v2696_v43, %v472_v16 }
  0xfb   :  { %v385_v35 = vadd.f32 %v2154_v31, %v2696_v43  ;;  %2227 = vmatprep.mubr.bf16.mxu1 %v606_v28  ;;  %v556_v44 = vmax.f32 %v374_v33, 0.0  ;;  %v2182_v28 = vpop.f32.mrf.mxu1  ;;  %v573_v31 = vmax.f32 %v441_v58, 0.0  ;;  %v570_v33 = vmax.f32 %v430_v4, 0.0 }
  0xfc   :  { %v376_v37 = vpop.f32.mrf.mxu0  ;;  %2228 = vmatmul.mubr.bf16.gmra.mxu1 %v607_v30  ;;  %v572_v30 = vmax.f32 %v438_v29, 0.0  ;;  %v486_v54 = vadd.f32 %v2696_v43, %v485_v23  ;;  %v494_v8 = vadd.f32 %v2801_v17, %v2696_v43  ;;  %v497_v10 = vadd.f32 %v2182_v28, %v2696_v43 }
  0xfd   :  { %v377_v38 = vadd.f32 %v2696_v43, %v376_v37  ;;  %v559_v40 = vmax.f32 %v385_v35, 0.0  ;;  %v571_v35 = vmax.f32 %v433_v27, 0.0  ;;  %v488_v36 = vpop.f32.mrf.mxu1 }
  0xfe   :  { %v2157_v41 = vpop.f32.mrf.mxu0  ;;  %v616_v37 = vpack.c.bf16 %v573_v31, %v572_v30  ;;  %v586_v16 = vmax.f32 %v494_v8, 0.0  ;;  %v587_v18 = vmax.f32 %v497_v10, 0.0 }
  0xff   :  { %v557_v45 = vmax.f32 %v377_v38, 0.0  ;;  %v609_v52 = vpack.c.bf16 %v559_v40, %v558_v46  ;;  %v398_v59 = vadd.f32 %v2157_v41, %v2696_v43  ;;  %v615_v38 = vpack.c.bf16 %v571_v35, %v570_v33  ;;  %v2185_v40 = vpop.f32.mrf.mxu1  ;;  %v2373_v41 = vld [vmem:[%s3159_s5] sm:$0xff]  }
 0x100   :  { %v389_v47 = vpop.f32.mrf.mxu0  ;;  %v575_v46 = vmax.f32 %v449_v24, 0.0  ;;  %2285 = vmatprep.subr.bf16.mxu0 %v2373_v41  ;;  %v623_v23 = vpack.c.bf16 %v587_v18, %v586_v16  ;;  %v2849_v24 = vld [vmem:[%s3160_s4] ss:$0 sm:$0xff]  ;;  %v1642_v18 = vld [vmem:[%s3161_s7 + $0x30] sm:$0xff] }
 0x101   :  { %v608_v49 = vpack.c.bf16 %v557_v45, %v556_v44  ;;  %v390_v55 = vadd.f32 %v2696_v43, %v389_v47  ;;  %v562_v5 = vmax.f32 %v398_v59, 0.0  ;;  %v576_v44 = vmax.f32 %v454_v39, 0.0  ;;  %2286 = vmatpush3.bf16.msra.mxu0 %v2373_v41  ;;  %v501_v32 = vpop.f32.mrf.mxu1 }
 0x102   :  { %v2158_v53 = vpop.f32.mrf.mxu0  ;;  %v577_v45 = vmax.f32 %v457_v56, 0.0  ;;  %v579_v59 = vmax.f32 %v465_v51, 0.0  ;;  %v1638_v51 = vld [vmem:[%s3161_s7 + $0x10] sm:$0xff] }
 0x103   :  { %v401_v57 = vadd.f32 %v2158_v53, %v2696_v43  ;;  %2231 = vmatprep.mubr.bf16.mxu1 %v608_v49  ;;  %v560_v9 = vmax.f32 %v390_v55, 0.0  ;;  %v617_v49 = vpack.c.bf16 %v575_v46, %v574_v12  ;;  %v580_v53 = vmax.f32 %v470_v34, 0.0 }
 0x104   :  { %v392_v60 = vpop.f32.mrf.mxu0  ;;  %2232 = vmatmul.mubr.bf16.gmra.mxu1 %v609_v52  ;;  %v618_v47 = vpack.c.bf16 %v577_v45, %v576_v44  ;;  %v2186_v52 = vpop.f32.mrf.mxu1  ;;  %v581_v55 = vmax.f32 %v473_v48, 0.0  ;;  %v2390_v46 = vmov 0   ;;  %v1636_v48 = vld [vmem:[%s3161_s7] sm:$0xff] }
 0x105   :  { %v393_v62 = vadd.f32 %v2696_v43, %v392_v60  ;;  %v563_v0 = vmax.f32 %v401_v57, 0.0  ;;  %v578_v57 = vmax.f32 %v462_v50, 0.0  ;;  %v513_v17 = vadd.f32 %v2186_v52, %v2696_v43  ;;  %2356 = vset.pattern.permute.xlu1 %v2390_v46  ;;  %2355 = vset.pattern.permute.xlu0 %v2390_v46 }
 0x106   :  { %v504_v60 = vpop.f32.mrf.mxu1  ;;  %v620_v61 = vpack.c.bf16 %v581_v55, %v580_v53  ;;  %1654 = vperm.xlu0 %2355, %v1636_v48   ;;  %v1641_v55 = vld [vmem:[%s3161_s7 + $0x28] sm:$0xff] }
 0x107   :  { %v561_v3 = vmax.f32 %v393_v62, 0.0  ;;  %v611_v13 = vpack.c.bf16 %v563_v0, %v562_v5  ;;  %v489_v62 = vadd.f32 %v2696_v43, %v488_v36  ;;  %v619_v63 = vpack.c.bf16 %v579_v59, %v578_v57 }
 0x108   :  { %v2189_v0 = vpop.f32.mrf.mxu1  ;;  %v582_v5 = vmax.f32 %v478_v2, 0.0  ;;  %v505_v42 = vadd.f32 %v2696_v43, %v504_v60  ;;  %v591_v27 = vmax.f32 %v513_v17, 0.0 }
 0x109   :  { %v610_v6 = vpack.c.bf16 %v561_v3, %v560_v9  ;;  %v584_v9 = vmax.f32 %v486_v54, 0.0  ;;  %v585_v3 = vmax.f32 %v489_v62, 0.0  ;;  %v526_v33 = vadd.f32 %v2189_v0, %v2696_v43  ;;  %v1639_v62 = vld [vmem:[%s3161_s7 + $0x18] sm:$0xff] }
 0x10a   :  { %v589_v21 = vmax.f32 %v505_v42, 0.0  ;;  %1679 = vperm.xlu0 %2355, %v1641_v55  }
 0x10b   :  { %2235 = vmatprep.mubr.bf16.mxu1 %v610_v6  ;;  %v583_v6 = vmax.f32 %v481_v22, 0.0  ;;  %v622_v11 = vpack.c.bf16 %v585_v3, %v584_v9  ;;  %v1643_v22 = vld [vmem:[%s3161_s7 + $0x38] sm:$0xff] }
 0x10c   :  { %2236 = vmatmul.mubr.bf16.gmra.mxu1 %v611_v13  ;;  %v502_v13 = vadd.f32 %v2696_v43, %v501_v32  ;;  %v1637_v32 = vld [vmem:[%s3161_s7 + $0x8] sm:$0xff] }
 0x10d   :  { %2239 = vmatprep.mubr.bf16.mxu1 %v612_v7  ;;  %v517_v7 = vpop.f32.mrf.mxu1  ;;  %v621_v15 = vpack.c.bf16 %v583_v6, %v582_v5  ;;  %1659 = vperm.xlu1 %2356, %v1637_v32  }
 0x10e   :  { %v588_v20 = vmax.f32 %v502_v13, 0.0  ;;  %v518_v58 = vadd.f32 %v2696_v43, %v517_v7  ;;  %v1640_v7 = vld [vmem:[%s3161_s7 + $0x20] sm:$0xff]  ;;  %1689 = vperm.xlu0 %2355, %v1643_v22  }
 0x10f   :  { %v2190_v1 = vpop.f32.mrf.mxu1 }
 0x110   :  { %v624_v29 = vpack.c.bf16 %v589_v21, %v588_v20  ;;  %v592_v28 = vmax.f32 %v518_v58, 0.0  ;;  %v529_v35 = vadd.f32 %v2190_v1, %v2696_v43 }
 0x111   :  { %v520_v19 = vpop.f32.mrf.mxu1  ;;  %1664 = vperm.xlu1 %2356, %v1638_v51  }
 0x112   :  { %v595_v39 = vmax.f32 %v529_v35, 0.0 }
 0x114   :  { %2240 = vmatmul.mubr.bf16.gmra.mxu1 %v613_v26  ;;  %v521_v26 = vadd.f32 %v2696_v43, %v520_v19  ;;  %v1647_v19 = vld [vmem:[%s3161_s7 + $0x58] sm:$0xff] }
 0x115   :  { %2243 = vmatprep.mubr.bf16.mxu1 %v614_v25  ;;  %v510_v25 = vadd.f32 %v2185_v40, %v2696_v43  ;;  %1669 = vperm.xlu1 %2356, %v1639_v62  }
 0x116   :  { %v593_v30 = vmax.f32 %v521_v26, 0.0  ;;  %v1644_v26 = vld [vmem:[%s3161_s7 + $0x40] sm:$0xff] }
 0x117   :  { %v590_v4 = vmax.f32 %v510_v25, 0.0 }
 0x118   :  { %v626_v36 = vpack.c.bf16 %v593_v30, %v592_v28  ;;  %v1649_v28 = vld [vmem:[%s3161_s7 + $0x68] sm:$0xff] }
 0x119   :  { %v625_v31 = vpack.c.bf16 %v591_v27, %v590_v4  ;;  %1674 = vperm.xlu1 %2356, %v1640_v7  }
 0x11c   :  { %2244 = vmatmul.mubr.bf16.gmra.mxu1 %v615_v38 }
 0x11d   :  { %2247 = vmatprep.mubr.bf16.mxu1 %v616_v37  ;;  %v594_v37 = vmax.f32 %v526_v33, 0.0  ;;  %1684 = vperm.xlu1 %2356, %v1642_v18  }
 0x11f   :  { %v627_v56 = vpack.c.bf16 %v595_v39, %v594_v37  ;;  %v1646_v37 = vld [vmem:[%s3161_s7 + $0x50] sm:$0xff] }
 0x121   :  { %1694 = vperm.xlu1 %2356, %v1644_v26  }
 0x124   :  { %2248 = vmatmul.mubr.bf16.gmra.mxu1 %v617_v49 }
 0x125   :  { %2251 = vmatprep.mubr.bf16.mxu1 %v618_v47  ;;  %1704 = vperm.xlu1 %2356, %v1646_v37  }
 0x12c   :  { %2252 = vmatmul.mubr.bf16.gmra.mxu1 %v619_v63 }
 0x12d   :  { %2255 = vmatprep.mubr.bf16.mxu1 %v620_v61 }
 0x134   :  { %2256 = vmatmul.mubr.bf16.gmra.mxu1 %v621_v15 }
 0x135   :  { %2259 = vmatprep.mubr.bf16.mxu1 %v622_v11  ;;  %v1645_v11 = vld [vmem:[%s3161_s7 + $0x48] sm:$0xff] }
 0x136   :  { %1699 = vperm.xlu0 %2355, %v1645_v11  }
 0x13a   :  { %1709 = vperm.xlu0 %2355, %v1647_v19  }
 0x13c   :  { %2260 = vmatmul.mubr.bf16.gmra.mxu1 %v623_v23 }
 0x13d   :  { %2263 = vmatprep.mubr.bf16.mxu1 %v624_v29 }
 0x13e   :  { %1719 = vperm.xlu0 %2355, %v1649_v28  }
 0x144   :  { %2264 = vmatmul.mubr.bf16.gmra.mxu1 %v625_v31 }
 0x145   :  { %2267 = vmatprep.mubr.bf16.mxu1 %v626_v36 }
 0x14c   :  { %2268 = vmatmul.mubr.bf16.gmra.mxu1 %v627_v56 }
 0x194   :  { %v2209_v38 = vpop.f32.mrf.mxu1 }
 0x195   :  { %v742_v43 = vadd.f32 %v2209_v38, %v2849_v24 }
 0x196   :  { %v733_v14 = vpop.f32.mrf.mxu1 }
 0x197   :  { %v734_v41 = vadd.f32 %v2849_v24, %v733_v14  ;;  %v990_v52 = vmax.f32 %v742_v43, 0.0  ;;  %v1648_v43 = vld [vmem:[%s3161_s7 + $0x60] sm:$0xff] }
 0x198   :  { %v2210_v40 = vpop.f32.mrf.mxu1  ;;  %1714 = vperm.xlu1 %2356, %v1648_v43  }
 0x199   :  { %v745_v44 = vadd.f32 %v2210_v40, %v2849_v24  ;;  %v988_v49 = vmax.f32 %v734_v41, 0.0 }
 0x19a   :  { %v736_v45 = vpop.f32.mrf.mxu1 }
 0x19b   :  { %v737_v12 = vadd.f32 %v2849_v24, %v736_v45  ;;  %v991_v47 = vmax.f32 %v745_v44, 0.0 }
 0x19c   :  { %v2213_v34 = vpop.f32.mrf.mxu1 }
 0x19d   :  { %v989_v50 = vmax.f32 %v737_v12, 0.0  ;;  %v1053_v59 = vpack.c.bf16 %v991_v47, %v990_v52  ;;  %v758_v63 = vadd.f32 %v2213_v34, %v2849_v24 }
 0x19e   :  { %v749_v53 = vpop.f32.mrf.mxu1 }
 0x19f   :  { %v1052_v57 = vpack.c.bf16 %v989_v50, %v988_v49  ;;  %v750_v61 = vadd.f32 %v2849_v24, %v749_v53  ;;  %v994_v8 = vmax.f32 %v758_v63, 0.0  ;;  %v1650_v49 = vld [vmem:[%s3161_s7 + $0x70] sm:$0xff] }
 0x1a0   :  { %v2214_v60 = vpop.f32.mrf.mxu1  ;;  %1724 = vperm.xlu1 %2356, %v1650_v49  }
 0x1a1   :  { %v761_v54 = vadd.f32 %v2214_v60, %v2849_v24  ;;  %2287 = vmatprep.mubr.bf16.mxu0 %v1052_v57  ;;  %v992_v5 = vmax.f32 %v750_v61, 0.0 }
 0x1a2   :  { %v752_v2 = vpop.f32.mrf.mxu1  ;;  %2288 = vmatmul.mubr.bf16.vlgmr.msra.gmra.mxu0 %v1053_v59 }
 0x1a3   :  { %v753_v0 = vadd.f32 %v2849_v24, %v752_v2  ;;  %v995_v9 = vmax.f32 %v761_v54, 0.0 }
 0x1a4   :  { %v2217_v3 = vpop.f32.mrf.mxu1 }
 0x1a5   :  { %v993_v6 = vmax.f32 %v753_v0, 0.0  ;;  %v1055_v42 = vpack.c.bf16 %v995_v9, %v994_v8  ;;  %v774_v20 = vadd.f32 %v2217_v3, %v2849_v24 }
 0x1a6   :  { %v765_v10 = vpop.f32.mrf.mxu1 }
 0x1a7   :  { %v1054_v13 = vpack.c.bf16 %v993_v6, %v992_v5  ;;  %v766_v1 = vadd.f32 %v2849_v24, %v765_v10  ;;  %v998_v4 = vmax.f32 %v774_v20, 0.0 }
 0x1a8   :  { %v2218_v15 = vpop.f32.mrf.mxu1 }
 0x1a9   :  { %v777_v16 = vadd.f32 %v2218_v15, %v2849_v24  ;;  %2291 = vmatprep.mubr.bf16.mxu0 %v1054_v13  ;;  %v996_v29 = vmax.f32 %v766_v1, 0.0 }
 0x1aa   :  { %v768_v21 = vpop.f32.mrf.mxu1  ;;  %2292 = vmatmul.mubr.bf16.gmra.mxu0 %v1055_v42 }
 0x1ab   :  { %v769_v23 = vadd.f32 %v2849_v24, %v768_v21  ;;  %v999_v25 = vmax.f32 %v777_v16, 0.0 }
 0x1ac   :  { %v2221_v17 = vpop.f32.mrf.mxu1 }
 0x1ad   :  { %v997_v58 = vmax.f32 %v769_v23, 0.0  ;;  %v1057_v31 = vpack.c.bf16 %v999_v25, %v998_v4  ;;  %v790_v39 = vadd.f32 %v2221_v17, %v2849_v24 }
 0x1ae   :  { %v781_v27 = vpop.f32.mrf.mxu1 }
 0x1af   :  { %v1056_v30 = vpack.c.bf16 %v997_v58, %v996_v29  ;;  %v782_v35 = vadd.f32 %v2849_v24, %v781_v27  ;;  %v1002_v45 = vmax.f32 %v790_v39, 0.0 }
 0x1b0   :  { %v2222_v33 = vpop.f32.mrf.mxu1 }
 0x1b1   :  { %v793_v36 = vadd.f32 %v2222_v33, %v2849_v24  ;;  %2295 = vmatprep.mubr.bf16.mxu0 %v1056_v30  ;;  %v1000_v41 = vmax.f32 %v782_v35, 0.0 }
 0x1b2   :  { %v784_v56 = vpop.f32.mrf.mxu1  ;;  %2296 = vmatmul.mubr.bf16.gmra.mxu0 %v1057_v31 }
 0x1b3   :  { %v785_v38 = vadd.f32 %v2849_v24, %v784_v56  ;;  %v1003_v14 = vmax.f32 %v793_v36, 0.0 }
 0x1b4   :  { %v2225_v40 = vpop.f32.mrf.mxu1 }
 0x1b5   :  { %v1001_v44 = vmax.f32 %v785_v38, 0.0  ;;  %v1059_v32 = vpack.c.bf16 %v1003_v14, %v1002_v45  ;;  %v806_v50 = vadd.f32 %v2225_v40, %v2849_v24 }
 0x1b6   :  { %v797_v12 = vpop.f32.mrf.mxu1 }
 0x1b7   :  { %v1058_v46 = vpack.c.bf16 %v1001_v44, %v1000_v41  ;;  %v798_v34 = vadd.f32 %v2849_v24, %v797_v12  ;;  %v1006_v60 = vmax.f32 %v806_v50, 0.0 }
 0x1b8   :  { %v2226_v47 = vpop.f32.mrf.mxu1 }
 0x1b9   :  { %v809_v48 = vadd.f32 %v2226_v47, %v2849_v24  ;;  %2299 = vmatprep.mubr.bf16.mxu0 %v1058_v46  ;;  %v1004_v57 = vmax.f32 %v798_v34, 0.0 }
 0x1ba   :  { %v800_v51 = vpop.f32.mrf.mxu1  ;;  %2300 = vmatmul.mubr.bf16.gmra.mxu0 %v1059_v32 }
 0x1bb   :  { %v801_v52 = vadd.f32 %v2849_v24, %v800_v51  ;;  %v1007_v53 = vmax.f32 %v809_v48, 0.0 }
 0x1bc   :  { %v2229_v55 = vpop.f32.mrf.mxu1 }
 0x1bd   :  { %v1005_v59 = vmax.f32 %v801_v52, 0.0  ;;  %v1061_v62 = vpack.c.bf16 %v1007_v53, %v1006_v60  ;;  %v822_v0 = vadd.f32 %v2229_v55, %v2849_v24 }
 0x1be   :  { %v813_v61 = vpop.f32.mrf.mxu1 }
 0x1bf   :  { %v1060_v54 = vpack.c.bf16 %v1005_v59, %v1004_v57  ;;  %v814_v2 = vadd.f32 %v2849_v24, %v813_v61  ;;  %v1010_v10 = vmax.f32 %v822_v0, 0.0 }
 0x1c0   :  { %v2230_v63 = vpop.f32.mrf.mxu1 }
 0x1c1   :  { %v825_v22 = vadd.f32 %v2230_v63, %v2849_v24  ;;  %2303 = vmatprep.mubr.bf16.mxu0 %v1060_v54  ;;  %v1008_v7 = vmax.f32 %v814_v2, 0.0 }
 0x1c2   :  { %v816_v9 = vpop.f32.mrf.mxu1  ;;  %2304 = vmatmul.mubr.bf16.gmra.mxu0 %v1061_v62 }
 0x1c3   :  { %v817_v3 = vadd.f32 %v2849_v24, %v816_v9  ;;  %v1011_v5 = vmax.f32 %v825_v22, 0.0 }
 0x1c4   :  { %v2233_v6 = vpop.f32.mrf.mxu1 }
 0x1c5   :  { %v1009_v8 = vmax.f32 %v817_v3, 0.0  ;;  %v1063_v42 = vpack.c.bf16 %v1011_v5, %v1010_v10  ;;  %v838_v18 = vadd.f32 %v2233_v6, %v2849_v24 }
 0x1c6   :  { %v829_v11 = vpop.f32.mrf.mxu1 }
 0x1c7   :  { %v1062_v13 = vpack.c.bf16 %v1009_v8, %v1008_v7  ;;  %v830_v1 = vadd.f32 %v2849_v24, %v829_v11  ;;  %v1014_v29 = vmax.f32 %v838_v18, 0.0 }
 0x1c8   :  { %v2234_v15 = vpop.f32.mrf.mxu1 }
 0x1c9   :  { %v841_v16 = vadd.f32 %v2234_v15, %v2849_v24  ;;  %2307 = vmatprep.mubr.bf16.mxu0 %v1062_v13  ;;  %v1012_v25 = vmax.f32 %v830_v1, 0.0 }
 0x1ca   :  { %v832_v20 = vpop.f32.mrf.mxu1  ;;  %2308 = vmatmul.mubr.bf16.gmra.mxu0 %v1063_v42 }
 0x1cb   :  { %v833_v21 = vadd.f32 %v2849_v24, %v832_v20  ;;  %v1015_v19 = vmax.f32 %v841_v16, 0.0 }
 0x1cc   :  { %v2237_v23 = vpop.f32.mrf.mxu1 }
 0x1cd   :  { %v1013_v17 = vmax.f32 %v833_v21, 0.0  ;;  %v1065_v4 = vpack.c.bf16 %v1015_v19, %v1014_v29  ;;  %v854_v31 = vadd.f32 %v2237_v23, %v2849_v24 }
 0x1ce   :  { %v845_v58 = vpop.f32.mrf.mxu1 }
 0x1cf   :  { %v1064_v26 = vpack.c.bf16 %v1013_v17, %v1012_v25  ;;  %v846_v28 = vadd.f32 %v2849_v24, %v845_v58  ;;  %v1018_v38 = vmax.f32 %v854_v31, 0.0 }
 0x1d0   :  { %v2238_v27 = vpop.f32.mrf.mxu1 }
 0x1d1   :  { %v857_v30 = vadd.f32 %v2238_v27, %v2849_v24  ;;  %2311 = vmatprep.mubr.bf16.mxu0 %v1064_v26  ;;  %v1016_v39 = vmax.f32 %v846_v28, 0.0 }
 0x1d2   :  { %v848_v33 = vpop.f32.mrf.mxu1  ;;  %2312 = vmatmul.mubr.bf16.gmra.mxu0 %v1065_v4 }
 0x1d3   :  { %v849_v35 = vadd.f32 %v2849_v24, %v848_v33  ;;  %v1019_v36 = vmax.f32 %v857_v30, 0.0 }
 0x1d4   :  { %v2241_v37 = vpop.f32.mrf.mxu1 }
 0x1d5   :  { %v1017_v56 = vmax.f32 %v849_v35, 0.0  ;;  %v1067_v41 = vpack.c.bf16 %v1019_v36, %v1018_v38  ;;  %v870_v12 = vadd.f32 %v2241_v37, %v2849_v24 }
 0x1d6   :  { %v861_v14 = vpop.f32.mrf.mxu1 }
 0x1d7   :  { %v1066_v40 = vpack.c.bf16 %v1017_v56, %v1016_v39  ;;  %v862_v43 = vadd.f32 %v2849_v24, %v861_v14  ;;  %v1022_v50 = vmax.f32 %v870_v12, 0.0 }
 0x1d8   :  { %v2242_v44 = vpop.f32.mrf.mxu1 }
 0x1d9   :  { %v873_v45 = vadd.f32 %v2242_v44, %v2849_v24  ;;  %2315 = vmatprep.mubr.bf16.mxu0 %v1066_v40  ;;  %v1020_v48 = vmax.f32 %v862_v43, 0.0 }
 0x1da   :  { %v864_v46 = vpop.f32.mrf.mxu1  ;;  %2316 = vmatmul.mubr.bf16.gmra.mxu0 %v1067_v41 }
 0x1db   :  { %v865_v32 = vadd.f32 %v2849_v24, %v864_v46  ;;  %v1023_v47 = vmax.f32 %v873_v45, 0.0 }
 0x1dc   :  { %v2245_v34 = vpop.f32.mrf.mxu1 }
 0x1dd   :  { %v1021_v49 = vmax.f32 %v865_v32, 0.0  ;;  %v1069_v53 = vpack.c.bf16 %v1023_v47, %v1022_v50  ;;  %v886_v60 = vadd.f32 %v2245_v34, %v2849_v24 }
 0x1de   :  { %v877_v51 = vpop.f32.mrf.mxu1 }
 0x1df   :  { %v1068_v52 = vpack.c.bf16 %v1021_v49, %v1020_v48  ;;  %v878_v57 = vadd.f32 %v2849_v24, %v877_v51  ;;  %v1026_v0 = vmax.f32 %v886_v60, 0.0 }
 0x1e0   :  { %v2246_v55 = vpop.f32.mrf.mxu1 }
 0x1e1   :  { %v889_v59 = vadd.f32 %v2246_v55, %v2849_v24  ;;  %2319 = vmatprep.mubr.bf16.mxu0 %v1068_v52  ;;  %v1024_v2 = vmax.f32 %v878_v57, 0.0 }
 0x1e2   :  { %v880_v61 = vpop.f32.mrf.mxu1  ;;  %2320 = vmatmul.mubr.bf16.gmra.mxu0 %v1069_v53 }
 0x1e3   :  { %v881_v54 = vadd.f32 %v2849_v24, %v880_v61  ;;  %v1027_v62 = vmax.f32 %v889_v59, 0.0 }
 0x1e4   :  { %v2249_v63 = vpop.f32.mrf.mxu1 }
 0x1e5   :  { %v1025_v22 = vmax.f32 %v881_v54, 0.0  ;;  %v1071_v5 = vpack.c.bf16 %v1027_v62, %v1026_v0  ;;  %v902_v10 = vadd.f32 %v2249_v63, %v2849_v24 }
 0x1e6   :  { %v893_v9 = vpop.f32.mrf.mxu1 }
 0x1e7   :  { %v1070_v3 = vpack.c.bf16 %v1025_v22, %v1024_v2  ;;  %v894_v7 = vadd.f32 %v2849_v24, %v893_v9  ;;  %v1030_v18 = vmax.f32 %v902_v10, 0.0 }
 0x1e8   :  { %v2250_v6 = vpop.f32.mrf.mxu1 }
 0x1e9   :  { %v905_v8 = vadd.f32 %v2250_v6, %v2849_v24  ;;  %2323 = vmatprep.mubr.bf16.mxu0 %v1070_v3  ;;  %v1028_v1 = vmax.f32 %v894_v7, 0.0 }
 0x1ea   :  { %v896_v11 = vpop.f32.mrf.mxu1  ;;  %2324 = vmatmul.mubr.bf16.gmra.mxu0 %v1071_v5 }
 0x1eb   :  { %v897_v13 = vadd.f32 %v2849_v24, %v896_v11  ;;  %v1031_v42 = vmax.f32 %v905_v8, 0.0 }
 0x1ec   :  { %v2253_v15 = vpop.f32.mrf.mxu1 }
 0x1ed   :  { %v1029_v16 = vmax.f32 %v897_v13, 0.0  ;;  %v1073_v19 = vpack.c.bf16 %v1031_v42, %v1030_v18  ;;  %v918_v29 = vadd.f32 %v2253_v15, %v2849_v24 }
 0x1ee   :  { %v909_v20 = vpop.f32.mrf.mxu1 }
 0x1ef   :  { %v1072_v21 = vpack.c.bf16 %v1029_v16, %v1028_v1  ;;  %v910_v25 = vadd.f32 %v2849_v24, %v909_v20  ;;  %v1034_v31 = vmax.f32 %v918_v29, 0.0 }
 0x1f0   :  { %v2254_v23 = vpop.f32.mrf.mxu1 }
 0x1f1   :  { %v921_v17 = vadd.f32 %v2254_v23, %v2849_v24  ;;  %2327 = vmatprep.mubr.bf16.mxu0 %v1072_v21  ;;  %v1032_v28 = vmax.f32 %v910_v25, 0.0 }
 0x1f2   :  { %v912_v58 = vpop.f32.mrf.mxu1  ;;  %2328 = vmatmul.mubr.bf16.gmra.mxu0 %v1073_v19 }
 0x1f3   :  { %v913_v26 = vadd.f32 %v2849_v24, %v912_v58  ;;  %v1035_v4 = vmax.f32 %v921_v17, 0.0 }
 0x1f4   :  { %v2257_v27 = vpop.f32.mrf.mxu1 }
 0x1f5   :  { %v1033_v30 = vmax.f32 %v913_v26, 0.0  ;;  %v1075_v36 = vpack.c.bf16 %v1035_v4, %v1034_v31  ;;  %v934_v38 = vadd.f32 %v2257_v27, %v2849_v24  ;;  %v2963_v4 = vld [vmem:[%s3162_s6] ss:$0 sm:$0xff] }
 0x1f6   :  { %v925_v33 = vpop.f32.mrf.mxu1 }
 0x1f7   :  { %v1074_v35 = vpack.c.bf16 %v1033_v30, %v1032_v28  ;;  %v926_v39 = vadd.f32 %v2849_v24, %v925_v33  ;;  %v1038_v12 = vmax.f32 %v934_v38, 0.0 }
 0x1f8   :  { %v2258_v37 = vpop.f32.mrf.mxu1 }
 0x1f9   :  { %v937_v56 = vadd.f32 %v2258_v37, %v2849_v24  ;;  %2331 = vmatprep.mubr.bf16.mxu0 %v1074_v35  ;;  %v1036_v43 = vmax.f32 %v926_v39, 0.0 }
 0x1fa   :  { %v928_v14 = vpop.f32.mrf.mxu1  ;;  %2332 = vmatmul.mubr.bf16.gmra.mxu0 %v1075_v36 }
 0x1fb   :  { %v929_v40 = vadd.f32 %v2849_v24, %v928_v14  ;;  %v1039_v41 = vmax.f32 %v937_v56, 0.0 }
 0x1fc   :  { %v2261_v44 = vpop.f32.mrf.mxu1 }
 0x1fd   :  { %v1037_v45 = vmax.f32 %v929_v40, 0.0  ;;  %v1077_v47 = vpack.c.bf16 %v1039_v41, %v1038_v12  ;;  %v950_v50 = vadd.f32 %v2261_v44, %v2849_v24 }
 0x1fe   :  { %v941_v46 = vpop.f32.mrf.mxu1 }
 0x1ff   :  { %v1076_v32 = vpack.c.bf16 %v1037_v45, %v1036_v43  ;;  %v942_v48 = vadd.f32 %v2849_v24, %v941_v46  ;;  %v1042_v60 = vmax.f32 %v950_v50, 0.0 }
 0x200   :  { %v2262_v34 = vpop.f32.mrf.mxu1 }
 0x201   :  { %v953_v49 = vadd.f32 %v2262_v34, %v2849_v24  ;;  %2335 = vmatprep.mubr.bf16.mxu0 %v1076_v32  ;;  %v1040_v57 = vmax.f32 %v942_v48, 0.0 }
 0x202   :  { %v944_v51 = vpop.f32.mrf.mxu1  ;;  %2336 = vmatmul.mubr.bf16.gmra.mxu0 %v1077_v47 }
 0x203   :  { %v945_v52 = vadd.f32 %v2849_v24, %v944_v51  ;;  %v1043_v53 = vmax.f32 %v953_v49, 0.0 }
 0x204   :  { %v2265_v55 = vpop.f32.mrf.mxu1 }
 0x205   :  { %v1041_v59 = vmax.f32 %v945_v52, 0.0  ;;  %v966_v61 = vadd.f32 %v2265_v55, %v2849_v24  ;;  %v1079_v2 = vpack.c.bf16 %v1043_v53, %v1042_v60 }
 0x206   :  { %v957_v54 = vpop.f32.mrf.mxu1 }
 0x207   :  { %v1078_v62 = vpack.c.bf16 %v1041_v59, %v1040_v57  ;;  %v958_v63 = vadd.f32 %v2849_v24, %v957_v54  ;;  %v1046_v9 = vmax.f32 %v966_v61, 0.0 }
 0x208   :  { %v2266_v22 = vpop.f32.mrf.mxu1 }
 0x209   :  { %v969_v0 = vadd.f32 %v2266_v22, %v2849_v24  ;;  %2339 = vmatprep.mubr.bf16.mxu0 %v1078_v62  ;;  %v1044_v5 = vmax.f32 %v958_v63, 0.0 }
 0x20a   :  { %v960_v3 = vpop.f32.mrf.mxu1  ;;  %2340 = vmatmul.mubr.bf16.gmra.mxu0 %v1079_v2 }
 0x20b   :  { %v1047_v6 = vmax.f32 %v969_v0, 0.0  ;;  %v961_v7 = vadd.f32 %v2849_v24, %v960_v3 }
 0x20c   :  { %v2269_v8 = vpop.f32.mrf.mxu1 }
 0x20d   :  { %v1045_v10 = vmax.f32 %v961_v7, 0.0  ;;  %v1081_v11 = vpack.c.bf16 %v1047_v6, %v1046_v9  ;;  %v982_v13 = vadd.f32 %v2269_v8, %v2849_v24 }
 0x20e   :  { %v973_v42 = vpop.f32.mrf.mxu1 }
 0x20f   :  { %v1080_v15 = vpack.c.bf16 %v1045_v10, %v1044_v5  ;;  %v974_v1 = vadd.f32 %v2849_v24, %v973_v42  ;;  %v1050_v20 = vmax.f32 %v982_v13, 0.0 }
 0x210   :  { %v2270_v16 = vpop.f32.mrf.mxu1 }
 0x211   :  { %2343 = vmatprep.mubr.bf16.mxu0 %v1080_v15  ;;  %v985_v18 = vadd.f32 %v2270_v16, %v2849_v24  ;;  %v1048_v19 = vmax.f32 %v974_v1, 0.0 }
 0x212   :  { %2344 = vmatmul.mubr.bf16.gmra.mxu0 %v1081_v11  ;;  %v976_v21 = vpop.f32.mrf.mxu1 }
 0x213   :  { %v1051_v23 = vmax.f32 %v985_v18, 0.0  ;;  %v977_v25 = vadd.f32 %v2849_v24, %v976_v21 }
 0x215   :  { %v1049_v17 = vmax.f32 %v977_v25, 0.0  ;;  %v1083_v29 = vpack.c.bf16 %v1051_v23, %v1050_v20 }
 0x217   :  { %v1082_v58 = vpack.c.bf16 %v1049_v17, %v1048_v19 }
 0x219   :  { %2347 = vmatprep.mubr.bf16.mxu0 %v1082_v58 }
 0x21a   :  { %2348 = vmatmul.mubr.bf16.gmra.mxu0 %v1083_v29 }
 0x262   :  { %v2289_v26 = vpop.f32.mrf.mxu0 }
 0x263   :  { %v1198_v36 = vadd.f32 %v2289_v26, %v2963_v4 }
 0x264   :  { %v1189_v27 = vpop.f32.mrf.mxu0 }
 0x265   :  { %v1190_v28 = vadd.f32 %v2963_v4, %v1189_v27  ;;  %v1446_v38 = vmax.f32 %v1198_v36, 0.0 }
 0x266   :  { %v2290_v30 = vpop.f32.mrf.mxu0 }
 0x267   :  { %v1444_v31 = vmax.f32 %v1190_v28, 0.0  ;;  %v1201_v14 = vadd.f32 %v2290_v30, %v2963_v4 }
 0x268   :  { %v1192_v33 = vpop.f32.mrf.mxu0 }
 0x269   :  { %v1193_v35 = vadd.f32 %v2963_v4, %v1192_v33  ;;  %1508 = vxpose.xlu0.b32.start [1/16] %v1444_v31, 128  ;;  %v1447_v44 = vmax.f32 %v1201_v14, 0.0  ;;  %v14_v31 = vstv %s3163_s8 }
 0x26a   :  { %v2293_v24 = vpop.f32.mrf.mxu0  ;;  %15 = vst [vmem:[#allocation2] sm:$0x1] %v14_v31 }
 0x26b   :  { %v1445_v37 = vmax.f32 %v1193_v35, 0.0  ;;  %v1214_v48 = vadd.f32 %v2293_v24, %v2963_v4 }
 0x26c   :  { %v1205_v39 = vpop.f32.mrf.mxu0 }
 0x26d   :  { %1509 = vxpose.xlu0.b32.cont [2/16] %v1445_v37, 128  ;;  %v1206_v43 = vadd.f32 %v2963_v4, %v1205_v39  ;;  %v1450_v52 = vmax.f32 %v1214_v48, 0.0 }
 0x26e   :  { %v2294_v56 = vpop.f32.mrf.mxu0 }
 0x26f   :  { %v1448_v46 = vmax.f32 %v1206_v43, 0.0  ;;  %v1217_v53 = vadd.f32 %v2294_v56, %v2963_v4 }
 0x270   :  { %v1208_v40 = vpop.f32.mrf.mxu0 }
 0x271   :  { %1510 = vxpose.xlu0.b32.cont [3/16] %v1446_v38, 128  ;;  %v1209_v32 = vadd.f32 %v2963_v4, %v1208_v40  ;;  %v1451_v59 = vmax.f32 %v1217_v53, 0.0 }
 0x272   :  { %v2297_v41 = vpop.f32.mrf.mxu0 }
 0x273   :  { %v1449_v49 = vmax.f32 %v1209_v32, 0.0  ;;  %v1230_v5 = vadd.f32 %v2297_v41, %v2963_v4 }
 0x274   :  { %v1221_v45 = vpop.f32.mrf.mxu0 }
 0x275   :  { %1511 = vxpose.xlu0.b32.cont [4/16] %v1447_v44, 128  ;;  %v1222_v60 = vadd.f32 %v2963_v4, %v1221_v45  ;;  %v1454_v13 = vmax.f32 %v1230_v5, 0.0 }
 0x276   :  { %v2298_v12 = vpop.f32.mrf.mxu0 }
 0x277   :  { %v1452_v63 = vmax.f32 %v1222_v60, 0.0  ;;  %v1233_v42 = vadd.f32 %v2298_v12, %v2963_v4 }
 0x278   :  { %v1224_v47 = vpop.f32.mrf.mxu0 }
 0x279   :  { %1512 = vxpose.xlu0.b32.cont [5/16] %v1448_v46, 128  ;;  %v1225_v2 = vadd.f32 %v2963_v4, %v1224_v47  ;;  %v1455_v20 = vmax.f32 %v1233_v42, 0.0 }
 0x27a   :  { %v2301_v34 = vpop.f32.mrf.mxu0 }
 0x27b   :  { %v1453_v6 = vmax.f32 %v1225_v2, 0.0  ;;  %v1246_v33 = vadd.f32 %v2301_v34, %v2963_v4 }
 0x27c   :  { %v1237_v50 = vpop.f32.mrf.mxu0 }
 0x27d   :  { %1513 = vxpose.xlu0.b32.cont [6/16] %v1449_v49, 128  ;;  %v1238_v21 = vadd.f32 %v2963_v4, %v1237_v50  ;;  %v1458_v56 = vmax.f32 %v1246_v33, 0.0 }
 0x27e   :  { %v2972_v51 = vpop.f32.mrf.mxu0 }
 0x27f   :  { %v1456_v29 = vmax.f32 %v1238_v21, 0.0  ;;  %v1249_v38 = vadd.f32 %v2972_v51, %v2963_v4 }
 0x280   :  { %v1240_v55 = vpop.f32.mrf.mxu0 }
 0x281   :  { %1514 = vxpose.xlu0.b32.cont [7/16] %v1450_v52, 128  ;;  %v1241_v58 = vadd.f32 %v2963_v4, %v1240_v55  ;;  %v1459_v43 = vmax.f32 %v1249_v38, 0.0 }
 0x282   :  { %v2305_v57 = vpop.f32.mrf.mxu0 }
 0x283   :  { %v1262_v7 = vadd.f32 %v2305_v57, %v2963_v4  ;;  %v1457_v35 = vmax.f32 %v1241_v58, 0.0 }
 0x284   :  { %v1253_v61 = vpop.f32.mrf.mxu0 }
 0x285   :  { %v1254_v54 = vadd.f32 %v2963_v4, %v1253_v61  ;;  %1515 = vxpose.xlu0.b32.cont [8/16] %v1451_v59, 128  ;;  %v1462_v15 = vmax.f32 %v1262_v7, 0.0 }
 0x286   :  { %v2306_v62 = vpop.f32.mrf.mxu0 }
 0x287   :  { %v1460_v22 = vmax.f32 %v1254_v54, 0.0  ;;  %v1265_v1 = vadd.f32 %v2306_v62, %v2963_v4 }
 0x288   :  { %v1256_v0 = vpop.f32.mrf.mxu0 }
 0x289   :  { %v1257_v9 = vadd.f32 %v2963_v4, %v1256_v0  ;;  %1540 = vxpose.xlu1.b32.start [1/16] %v1460_v22, 128  ;;  %1516 = vxpose.xlu0.b32.cont [9/16] %v1452_v63, 128  ;;  %v1463_v19 = vmax.f32 %v1265_v1, 0.0 }
 0x28a   :  { %v2309_v3 = vpop.f32.mrf.mxu0 }
 0x28b   :  { %v1461_v8 = vmax.f32 %v1257_v9, 0.0  ;;  %v1278_v24 = vadd.f32 %v2309_v3, %v2963_v4 }
 0x28c   :  { %v1269_v10 = vpop.f32.mrf.mxu0 }
 0x28d   :  { %1541 = vxpose.xlu1.b32.cont [2/16] %v1461_v8, 128  ;;  %1517 = vxpose.xlu0.b32.cont [10/16] %v1453_v6, 128  ;;  %v1270_v23 = vadd.f32 %v2963_v4, %v1269_v10  ;;  %v1466_v14 = vmax.f32 %v1278_v24, 0.0 }
 0x28e   :  { %v2310_v11 = vpop.f32.mrf.mxu0 }
 0x28f   :  { %v1464_v26 = vmax.f32 %v1270_v23, 0.0  ;;  %v1281_v40 = vadd.f32 %v2310_v11, %v2963_v4 }
 0x290   :  { %v1272_v16 = vpop.f32.mrf.mxu0 }
 0x291   :  { %1542 = vxpose.xlu1.b32.cont [3/16] %v1462_v15, 128  ;;  %1518 = vxpose.xlu0.b32.cont [11/16] %v1454_v13, 128  ;;  %v1273_v27 = vadd.f32 %v2963_v4, %v1272_v16  ;;  %v1467_v45 = vmax.f32 %v1281_v40, 0.0 }
 0x292   :  { %v2313_v18 = vpop.f32.mrf.mxu0 }
 0x293   :  { %v1465_v36 = vmax.f32 %v1273_v27, 0.0  ;;  %v1294_v53 = vadd.f32 %v2313_v18, %v2963_v4 }
 0x294   :  { %v1285_v25 = vpop.f32.mrf.mxu0 }
 0x295   :  { %1543 = vxpose.xlu1.b32.cont [4/16] %v1463_v19, 128  ;;  %1519 = vxpose.xlu0.b32.cont [12/16] %v1455_v20, 128  ;;  %v1286_v12 = vadd.f32 %v2963_v4, %v1285_v25  ;;  %v1470_v54 = vmax.f32 %v1294_v53, 0.0 }
 0x296   :  { %v2314_v17 = vpop.f32.mrf.mxu0 }
 0x297   :  { %v1468_v34 = vmax.f32 %v1286_v12, 0.0  ;;  %v1297_v62 = vadd.f32 %v2314_v17, %v2963_v4 }
 0x298   :  { %v1288_v28 = vpop.f32.mrf.mxu0 }
 0x299   :  { %1544 = vxpose.xlu1.b32.cont [5/16] %v1464_v26, 128  ;;  %1520 = vxpose.xlu0.b32.cont [13/16] %v1456_v29, 128  ;;  %v1289_v48 = vadd.f32 %v2963_v4, %v1288_v28  ;;  %v1471_v9 = vmax.f32 %v1297_v62, 0.0 }
 0x29a   :  { %v2987_v30 = vpop.f32.mrf.mxu0 }
 0x29b   :  { %v1469_v55 = vmax.f32 %v1289_v48, 0.0  ;;  %v1310_v16 = vadd.f32 %v2987_v30, %v2963_v4  ;;  %v3021_v30 = vpop.permute.xlu0 %1654 }
 0x29c   :  { %v1301_v37 = vpop.f32.mrf.mxu0 }
 0x29d   :  { %1545 = vxpose.xlu1.b32.cont [6/16] %v1465_v36, 128  ;;  %1521 = vxpose.xlu0.b32.cont [14/16] %v1457_v35, 128  ;;  %v1302_v3 = vadd.f32 %v2963_v4, %v1301_v37  ;;  %v1474_v25 = vmax.f32 %v1310_v16, 0.0 }
 0x29e   :  { %v2994_v39 = vpop.f32.mrf.mxu0 }
 0x29f   :  { %v1472_v10 = vmax.f32 %v1302_v3, 0.0  ;;  %v1313_v17 = vadd.f32 %v2994_v39, %v2963_v4 }
 0x2a0   :  { %v1304_v41 = vpop.f32.mrf.mxu0 }
 0x2a1   :  { %1546 = vxpose.xlu1.b32.cont [7/16] %v1466_v14, 128  ;;  %1522 = vxpose.xlu0.b32.cont [15/16] %v1458_v56, 128  ;;  %v1305_v11 = vadd.f32 %v2963_v4, %v1304_v41  ;;  %v1475_v28 = vmax.f32 %v1313_v17, 0.0  ;;  %v3026_v14 = vpop.permute.xlu0 %1679 }
 0x2a2   :  { %v2321_v44 = vpop.f32.mrf.mxu0 }
 0x2a3   :  { %v1326_v57 = vadd.f32 %v2321_v44, %v2963_v4  ;;  %v1473_v18 = vmax.f32 %v1305_v11, 0.0 }
 0x2a4   :  { %v1317_v46 = vpop.f32.mrf.mxu0 }
 0x2a5   :  { %v1318_v32 = vadd.f32 %v2963_v4, %v1317_v46  ;;  %1547 = vxpose.xlu1.b32.cont [8/16] %v1467_v45, 128  ;;  %1523 = vxpose.xlu0.b32.end [16/16] %v1459_v43, 128  ;;  %v1478_v63 = vmax.f32 %v1326_v57, 0.0 }
 0x2a6   :  { %v2322_v47 = vpop.f32.mrf.mxu0 }
 0x2a7   :  { %v1476_v49 = vmax.f32 %v1318_v32, 0.0  ;;  %v1329_v2 = vadd.f32 %v2322_v47, %v2963_v4  ;;  %v3031_v32 = vpop.permute.xlu0 %1689 }
 0x2a8   :  { %v1320_v50 = vpop.f32.mrf.mxu0 }
 0x2a9   :  { %v1321_v51 = vadd.f32 %v2963_v4, %v1320_v50  ;;  %1548 = vxpose.xlu1.b32.cont [9/16] %v1468_v34, 128  ;;  %1572 = vxpose.xlu0.b32.start [1/16] %v1476_v49, 128  ;;  %v1479_v5 = vmax.f32 %v1329_v2, 0.0 }
 0x2aa   :  { %v2325_v52 = vpop.f32.mrf.mxu0 }
 0x2ab   :  { %v1477_v59 = vmax.f32 %v1321_v51, 0.0  ;;  %v1342_v20 = vadd.f32 %v2325_v52, %v2963_v4  ;;  %v3035_v51 = vpop.permute.xlu1 %1659 }
 0x2ac   :  { %v1333_v60 = vpop.f32.mrf.mxu0 }
 0x2ad   :  { %1549 = vxpose.xlu1.b32.cont [10/16] %v1469_v55, 128  ;;  %1573 = vxpose.xlu0.b32.cont [2/16] %v1477_v59, 128  ;;  %v1334_v6 = vadd.f32 %v2963_v4, %v1333_v60  ;;  %v1482_v29 = vmax.f32 %v1342_v20, 0.0  ;;  %v3039_v60 = vpop.permute.xlu0 %1699 }
 0x2ae   :  { %v2326_v61 = vpop.f32.mrf.mxu0 }
 0x2af   :  { %v1480_v13 = vmax.f32 %v1334_v6, 0.0  ;;  %v1345_v58 = vadd.f32 %v2326_v61, %v2963_v4  ;;  %v3041_v61 = vpop.permute.xlu1 %1664 }
 0x2b0   :  { %v1336_v22 = vpop.f32.mrf.mxu0 }
 0x2b1   :  { %1550 = vxpose.xlu1.b32.cont [11/16] %v1470_v54, 128  ;;  %1574 = vxpose.xlu0.b32.cont [3/16] %v1478_v63, 128  ;;  %v1337_v42 = vadd.f32 %v2963_v4, %v1336_v22  ;;  %v1483_v31 = vmax.f32 %v1345_v58, 0.0 }
 0x2b2   :  { %v2329_v0 = vpop.f32.mrf.mxu0 }
 0x2b3   :  { %v1481_v21 = vmax.f32 %v1337_v42, 0.0  ;;  %v1358_v44 = vadd.f32 %v2329_v0, %v2963_v4  ;;  %v3045_v0 = vpop.permute.xlu0 %1709 }
 0x2b4   :  { %v1349_v7 = vpop.f32.mrf.mxu0 }
 0x2b5   :  { %1551 = vxpose.xlu1.b32.cont [12/16] %v1471_v9, 128  ;;  %1575 = vxpose.xlu0.b32.cont [4/16] %v1479_v5, 128  ;;  %v1350_v33 = vadd.f32 %v2963_v4, %v1349_v7  ;;  %v1486_v47 = vmax.f32 %v1358_v44, 0.0 }
 0x2b6   :  { %v2330_v8 = vpop.f32.mrf.mxu0 }
 0x2b7   :  { %v1484_v37 = vmax.f32 %v1350_v33, 0.0  ;;  %v1361_v34 = vadd.f32 %v2330_v8, %v2963_v4  ;;  %v3050_v8 = vpop.permute.xlu1 %1669  ;;  %v3055_v16 = vpop.permute.xlu0 %1719 }
 0x2b8   :  { %v1352_v15 = vpop.f32.mrf.mxu0 }
 0x2b9   :  { %1552 = vxpose.xlu1.b32.cont [13/16] %v1472_v10, 128  ;;  %1576 = vxpose.xlu0.b32.cont [5/16] %v1480_v13, 128  ;;  %v1353_v39 = vadd.f32 %v2963_v4, %v1352_v15  ;;  %v1487_v52 = vmax.f32 %v1361_v34, 0.0 }
 0x2ba   :  { %v3011_v1 = vpop.f32.mrf.mxu0 }
 0x2bb   :  { %v1485_v43 = vmax.f32 %v1353_v39, 0.0  ;;  %v1374_v9 = vadd.f32 %v3011_v1, %v2963_v4  ;;  %v3057_v1 = vpop.permute.xlu1 %1674 }
 0x2bc   :  { %v1365_v19 = vpop.f32.mrf.mxu0 }
 0x2bd   :  { %1553 = vxpose.xlu1.b32.cont [14/16] %v1473_v18, 128  ;;  %1577 = vxpose.xlu0.b32.cont [6/16] %v1481_v21, 128  ;;  %v1366_v53 = vadd.f32 %v2963_v4, %v1365_v19  ;;  %v1490_v10 = vmax.f32 %v1374_v9, 0.0 }
 0x2be   :  { %v3016_v23 = vpop.f32.mrf.mxu0 }
 0x2bf   :  { %v1488_v54 = vmax.f32 %v1366_v53, 0.0  ;;  %v1377_v11 = vadd.f32 %v3016_v23, %v2963_v4  ;;  %v3061_v58 = vpop.permute.xlu1 %1684 }
 0x2c0   :  { %v1368_v26 = vpop.f32.mrf.mxu0 }
 0x2c1   :  { %1554 = vxpose.xlu1.b32.cont [15/16] %v1474_v25, 128  ;;  %1578 = vxpose.xlu0.b32.cont [7/16] %v1482_v29, 128  ;;  %v1369_v62 = vadd.f32 %v2963_v4, %v1368_v26  ;;  %v1491_v18 = vmax.f32 %v1377_v11, 0.0 }
 0x2c2   :  { %v2337_v27 = vpop.f32.mrf.mxu0 }
 0x2c3   :  { %v1390_v45 = vadd.f32 %v2337_v27, %v2963_v4  ;;  %v1489_v3 = vmax.f32 %v1369_v62, 0.0  ;;  %v3067_v39 = vpop.permute.xlu1 %1694 }
 0x2c4   :  { %v1381_v35 = vpop.f32.mrf.mxu0 }
 0x2c5   :  { %v1382_v24 = vadd.f32 %v2963_v4, %v1381_v35  ;;  %1555 = vxpose.xlu1.b32.end [16/16] %v1475_v28, 128  ;;  %1579 = vxpose.xlu0.b32.cont [8/16] %v1483_v31, 128  ;;  %v1494_v48 = vmax.f32 %v1390_v45, 0.0 }
 0x2c6   :  { %v2338_v36 = vpop.f32.mrf.mxu0 }
 0x2c7   :  { %v1492_v56 = vmax.f32 %v1382_v24, 0.0  ;;  %v1393_v49 = vadd.f32 %v2338_v36, %v2963_v4  ;;  %v3072_v34 = vpop.permute.xlu1 %1704 }
 0x2c8   :  { %v1384_v38 = vpop.f32.mrf.mxu0 }
 0x2c9   :  { %v1385_v40 = vadd.f32 %v2963_v4, %v1384_v38  ;;  %1604 = vxpose.xlu1.b32.start [1/16] %v1492_v56, 128  ;;  %1580 = vxpose.xlu0.b32.cont [9/16] %v1484_v37, 128  ;;  %v1495_v55 = vmax.f32 %v1393_v49, 0.0 }
 0x2ca   :  { %v2341_v41 = vpop.f32.mrf.mxu0 }
 0x2cb   :  { %v1493_v12 = vmax.f32 %v1385_v40, 0.0  ;;  %v1406_v5 = vadd.f32 %v2341_v41, %v2963_v4 }
 0x2cc   :  { %v1397_v46 = vpop.f32.mrf.mxu0 }
 0x2cd   :  { %1605 = vxpose.xlu1.b32.cont [2/16] %v1493_v12, 128  ;;  %1581 = vxpose.xlu0.b32.cont [10/16] %v1485_v43, 128  ;;  %v1398_v57 = vadd.f32 %v2963_v4, %v1397_v46  ;;  %v1498_v13 = vmax.f32 %v1406_v5, 0.0 }
 0x2ce   :  { %v2342_v50 = vpop.f32.mrf.mxu0 }
 0x2cf   :  { %v1496_v63 = vmax.f32 %v1398_v57, 0.0  ;;  %v1409_v42 = vadd.f32 %v2342_v50, %v2963_v4 }
 0x2d0   :  { %v1400_v59 = vpop.f32.mrf.mxu0 }
 0x2d1   :  { %1606 = vxpose.xlu1.b32.cont [3/16] %v1494_v48, 128  ;;  %1582 = vxpose.xlu0.b32.cont [11/16] %v1486_v47, 128  ;;  %v1401_v2 = vadd.f32 %v2963_v4, %v1400_v59  ;;  %v1499_v20 = vmax.f32 %v1409_v42, 0.0  ;;  %v3077_v59 = vpop.permute.xlu1 %1714 }
 0x2d2   :  { %v2345_v22 = vpop.f32.mrf.mxu0 }
 0x2d3   :  { %v1497_v6 = vmax.f32 %v1401_v2, 0.0  ;;  %v1422_v31 = vadd.f32 %v2345_v22, %v2963_v4 }
 0x2d4   :  { %v1413_v7 = vpop.f32.mrf.mxu0 }
 0x2d5   :  { %1607 = vxpose.xlu1.b32.cont [4/16] %v1495_v55, 128  ;;  %1583 = vxpose.xlu0.b32.cont [12/16] %v1487_v52, 128  ;;  %v1414_v21 = vadd.f32 %v2963_v4, %v1413_v7  ;;  %v1502_v56 = vmax.f32 %v1422_v31, 0.0 }
 0x2d6   :  { %v2346_v15 = vpop.f32.mrf.mxu0 }
 0x2d7   :  { %v1500_v17 = vmax.f32 %v1414_v21, 0.0  ;;  %v1425_v38 = vadd.f32 %v2346_v15, %v2963_v4 }
 0x2d8   :  { %v1416_v19 = vpop.f32.mrf.mxu0 }
 0x2d9   :  { %1608 = vxpose.xlu1.b32.cont [5/16] %v1496_v63, 128  ;;  %1584 = vxpose.xlu0.b32.cont [13/16] %v1488_v54, 128  ;;  %v1417_v23 = vadd.f32 %v2963_v4, %v1416_v19  ;;  %v1503_v45 = vmax.f32 %v1425_v38, 0.0 }
 0x2da   :  { %v2349_v29 = vpop.f32.mrf.mxu0 }
 0x2db   :  { %v1501_v33 = vmax.f32 %v1417_v23, 0.0  ;;  %v1438_v54 = vadd.f32 %v2349_v29, %v2963_v4  ;;  %v1651_v23 = vld [vmem:[%s3161_s7 + $0x78] sm:$0xff] }
 0x2dc   :  { %v1429_v35 = vpop.f32.mrf.mxu0 }
 0x2dd   :  { %1609 = vxpose.xlu1.b32.cont [6/16] %v1497_v6, 128  ;;  %1585 = vxpose.xlu0.b32.cont [14/16] %v1489_v3, 128  ;;  %v1430_v12 = vadd.f32 %v2963_v4, %v1429_v35  ;;  %v1506_v9 = vmax.f32 %v1438_v54, 0.0  ;;  %v3082_v6 = vpop.permute.xlu1 %1724 }
 0x2de   :  { %v2350_v40 = vpop.f32.mrf.mxu0 }
 0x2df   :  { %v1504_v50 = vmax.f32 %v1430_v12, 0.0  ;;  %v1441_v3 = vadd.f32 %v2350_v40, %v2963_v4 }
 0x2e0   :  { %v1432_v46 = vpop.f32.mrf.mxu0 }
 0x2e1   :  { %1610 = vxpose.xlu1.b32.cont [7/16] %v1498_v13, 128  ;;  %1586 = vxpose.xlu0.b32.cont [15/16] %v1490_v10, 128  ;;  %v1433_v52 = vadd.f32 %v2963_v4, %v1432_v46  ;;  %v1507_v11 = vmax.f32 %v1441_v3, 0.0 }
 0x2e3   :  { %v1505_v62 = vmax.f32 %v1433_v52, 0.0 }
 0x2e5   :  { %1611 = vxpose.xlu1.b32.cont [8/16] %v1499_v20, 128  ;;  %1587 = vxpose.xlu0.b32.end [16/16] %v1491_v18, 128  ;;  %v1524_v25 = vpop.trf.xlu0 }
 0x2e6   :  { %v1732_v27 = vmul.f32 %v3021_v30, %v1524_v25 }
 0x2e9   :  { %1612 = vxpose.xlu1.b32.cont [9/16] %v1500_v17, 128  ;;  %v1525_v26 = vpop.trf.xlu0 }
 0x2ea   :  { %v1736_v28 = vmul.f32 %v3035_v51, %v1525_v26 }
 0x2ec   :  { %v1796_v24 = vadd.f32 %v1736_v28, %v1732_v27 }
 0x2ed   :  { %1613 = vxpose.xlu1.b32.cont [10/16] %v1501_v33, 128  ;;  %v1526_v36 = vpop.trf.xlu0 }
 0x2ee   :  { %v1740_v37 = vmul.f32 %v3041_v61, %v1526_v36 }
 0x2f0   :  { %v1797_v41 = vadd.f32 %v1796_v24, %v1740_v37 }
 0x2f1   :  { %1614 = vxpose.xlu1.b32.cont [11/16] %v1502_v56, 128  ;;  %v1527_v44 = vpop.trf.xlu0 }
 0x2f2   :  { %v1744_v43 = vmul.f32 %v3050_v8, %v1527_v44 }
 0x2f4   :  { %v1798_v47 = vadd.f32 %v1797_v41, %v1744_v43 }
 0x2f5   :  { %1615 = vxpose.xlu1.b32.cont [12/16] %v1503_v45, 128  ;;  %v1528_v48 = vpop.trf.xlu0 }
 0x2f6   :  { %v1748_v49 = vmul.f32 %v3057_v1, %v1528_v48 }
 0x2f8   :  { %v1799_v53 = vadd.f32 %v1798_v47, %v1748_v49 }
 0x2f9   :  { %1616 = vxpose.xlu1.b32.cont [13/16] %v1504_v50, 128  ;;  %v1529_v55 = vpop.trf.xlu0 }
 0x2fa   :  { %v1752_v57 = vmul.f32 %v3026_v14, %v1529_v55 }
 0x2fc   :  { %v1800_v63 = vadd.f32 %v1799_v53, %v1752_v57 }
 0x2fd   :  { %1617 = vxpose.xlu1.b32.cont [14/16] %v1505_v62, 128  ;;  %v1530_v2 = vpop.trf.xlu0 }
 0x2fe   :  { %v1756_v22 = vmul.f32 %v3061_v58, %v1530_v2 }
 0x300   :  { %v1801_v5 = vadd.f32 %v1800_v63, %v1756_v22 }
 0x301   :  { %1618 = vxpose.xlu1.b32.cont [15/16] %v1506_v9, 128  ;;  %v1531_v7 = vpop.trf.xlu0  ;;  %v1880_v9 = vld [vmem:[#allocation2] sm:$0x1] }
 0x302   :  { %v1760_v10 = vmul.f32 %v3031_v32, %v1531_v7 }
 0x304   :  { %v1802_v13 = vadd.f32 %v1801_v5, %v1760_v10 }
 0x305   :  { %1619 = vxpose.xlu1.b32.end [16/16] %v1507_v11, 128  ;;  %v1556_v42 = vpop.trf.xlu1  ;;  %v1532_v15 = vpop.trf.xlu0 }
 0x306   :  { %v1764_v18 = vmul.f32 %v3067_v39, %v1532_v15  ;;  %v1733_v25 = vmul.f32 %v3021_v30, %v1556_v42 }
 0x308   :  { %v1803_v20 = vadd.f32 %v1802_v13, %v1764_v18 }
 0x309   :  { %v1557_v21 = vpop.trf.xlu1  ;;  %v1533_v19 = vpop.trf.xlu0 }
 0x30a   :  { %v1737_v4 = vmul.f32 %v3035_v51, %v1557_v21  ;;  %v1768_v17 = vmul.f32 %v3039_v60, %v1533_v19 }
 0x30c   :  { %v1817_v29 = vadd.f32 %v1737_v4, %v1733_v25  ;;  %v1804_v26 = vadd.f32 %v1803_v20, %v1768_v17 }
 0x30d   :  { %v1558_v27 = vpop.trf.xlu1  ;;  %v1534_v28 = vpop.trf.xlu0 }
 0x30e   :  { %v1741_v31 = vmul.f32 %v3041_v61, %v1558_v27  ;;  %v1772_v33 = vmul.f32 %v3072_v34, %v1534_v28  ;;  %1729 = vperm.xlu0 %2355, %v1651_v23  }
 0x310   :  { %v1818_v35 = vadd.f32 %v1817_v29, %v1741_v31  ;;  %v1805_v24 = vadd.f32 %v1804_v26, %v1772_v33 }
 0x311   :  { %v1559_v36 = vpop.trf.xlu1  ;;  %v1535_v37 = vpop.trf.xlu0 }
 0x312   :  { %v1745_v56 = vmul.f32 %v3050_v8, %v1559_v36  ;;  %v1776_v38 = vmul.f32 %v3045_v0, %v1535_v37 }
 0x314   :  { %v1819_v40 = vadd.f32 %v1818_v35, %v1745_v56  ;;  %v1806_v41 = vadd.f32 %v1805_v24, %v1776_v38 }
 0x315   :  { %v1560_v44 = vpop.trf.xlu1  ;;  %v1536_v43 = vpop.trf.xlu0 }
 0x316   :  { %v1749_v45 = vmul.f32 %v3057_v1, %v1560_v44  ;;  %v1780_v12 = vmul.f32 %v3077_v59, %v1536_v43 }
 0x318   :  { %v1820_v46 = vadd.f32 %v1819_v40, %v1749_v45  ;;  %v1807_v47 = vadd.f32 %v1806_v41, %v1780_v12 }
 0x319   :  { %v1561_v48 = vpop.trf.xlu1  ;;  %v1537_v49 = vpop.trf.xlu0 }
 0x31a   :  { %v1753_v50 = vmul.f32 %v3026_v14, %v1561_v48  ;;  %v1784_v52 = vmul.f32 %v3055_v16, %v1537_v49 }
 0x31c   :  { %v1821_v53 = vadd.f32 %v1820_v46, %v1753_v50  ;;  %v1808_v55 = vadd.f32 %v1807_v47, %v1784_v52 }
 0x31d   :  { %v1562_v57 = vpop.trf.xlu1  ;;  %v1538_v54 = vpop.trf.xlu0 }
 0x31e   :  { %v1757_v62 = vmul.f32 %v3061_v58, %v1562_v57  ;;  %v1788_v63 = vmul.f32 %v3082_v6, %v1538_v54 }
 0x320   :  { %v1822_v2 = vadd.f32 %v1821_v53, %v1757_v62  ;;  %v3102_v22 = vadd.f32 %v1808_v55, %v1788_v63 }
 0x321   :  { %v1563_v3 = vpop.trf.xlu1  ;;  %v3105_v10 = vpop.trf.xlu0 }
 0x322   :  { %v1761_v5 = vmul.f32 %v3031_v32, %v1563_v3 }
 0x323   :  { %1883 = vperm.xlu1 %2356, %v1880_v9  }
 0x324   :  { %v1823_v7 = vadd.f32 %v1822_v2, %v1761_v5 }
 0x325   :  { %v1564_v11 = vpop.trf.xlu1  ;;  %v1588_v20 = vpop.trf.xlu0 }
 0x326   :  { %v1765_v13 = vmul.f32 %v3067_v39, %v1564_v11  ;;  %v1734_v5 = vmul.f32 %v3021_v30, %v1588_v20 }
 0x328   :  { %v1824_v42 = vadd.f32 %v1823_v7, %v1765_v13 }
 0x329   :  { %v1565_v15 = vpop.trf.xlu1  ;;  %v1589_v17 = vpop.trf.xlu0 }
 0x32a   :  { %v1769_v18 = vmul.f32 %v3039_v60, %v1565_v15  ;;  %v1738_v9 = vmul.f32 %v3035_v51, %v1589_v17 }
 0x32c   :  { %v1825_v21 = vadd.f32 %v1824_v42, %v1769_v18  ;;  %v1838_v18 = vadd.f32 %v1738_v9, %v1734_v5 }
 0x32d   :  { %v1566_v19 = vpop.trf.xlu1  ;;  %v1590_v31 = vpop.trf.xlu0 }
 0x32e   :  { %v1773_v25 = vmul.f32 %v3072_v34, %v1566_v19  ;;  %v1742_v7 = vmul.f32 %v3041_v61, %v1590_v31 }
 0x330   :  { %v1826_v4 = vadd.f32 %v1825_v21, %v1773_v25 }
 0x331   :  { %v1567_v23 = vpop.trf.xlu1  ;;  %v1591_v37 = vpop.trf.xlu0 }
 0x332   :  { %v1777_v29 = vmul.f32 %v3045_v0, %v1567_v23  ;;  %v1746_v21 = vmul.f32 %v3050_v8, %v1591_v37 }
 0x334   :  { %v1827_v26 = vadd.f32 %v1826_v4, %v1777_v29  ;;  %v1839_v4 = vadd.f32 %v1838_v18, %v1742_v7 }
 0x335   :  { %v1568_v27 = vpop.trf.xlu1  ;;  %v1592_v44 = vpop.trf.xlu0 }
 0x336   :  { %v1781_v28 = vmul.f32 %v3077_v59, %v1568_v27  ;;  %v1750_v17 = vmul.f32 %v3057_v1, %v1592_v44  ;;  %v1840_v29 = vadd.f32 %v1839_v4, %v1746_v21 }
 0x338   :  { %v1828_v33 = vadd.f32 %v1827_v26, %v1781_v28  ;;  %v1841_v28 = vadd.f32 %v1840_v29, %v1750_v17 }
 0x339   :  { %v1569_v35 = vpop.trf.xlu1  ;;  %v1593_v45 = vpop.trf.xlu0 }
 0x33a   :  { %v1785_v24 = vmul.f32 %v3055_v16, %v1569_v35 }
 0x33c   :  { %v1829_v36 = vadd.f32 %v1828_v33, %v1785_v24 }
 0x33d   :  { %v1570_v56 = vpop.trf.xlu1  ;;  %v1594_v47 = vpop.trf.xlu0 }
 0x33e   :  { %v1789_v38 = vmul.f32 %v3082_v6, %v1570_v56  ;;  %v1758_v31 = vmul.f32 %v3061_v58, %v1594_v47 }
 0x340   :  { %v3114_v40 = vadd.f32 %v1829_v36, %v1789_v38 }
 0x341   :  { %v3116_v41 = vpop.trf.xlu1  ;;  %v1595_v49 = vpop.trf.xlu0 }
 0x342   :  { %v1762_v36 = vmul.f32 %v3031_v32, %v1595_v49 }
 0x345   :  { %v1620_v43 = vpop.trf.xlu1  ;;  %v1596_v53 = vpop.trf.xlu0 }
 0x346   :  { %v1735_v11 = vmul.f32 %v3021_v30, %v1620_v43  ;;  %v1754_v30 = vmul.f32 %v3026_v14, %v1593_v45  ;;  %v1766_v38 = vmul.f32 %v3067_v39, %v1596_v53 }
 0x348   :  { %v1842_v24 = vadd.f32 %v1841_v28, %v1754_v30 }
 0x349   :  { %v1621_v12 = vpop.trf.xlu1  ;;  %v1597_v57 = vpop.trf.xlu0 }
 0x34a   :  { %v1739_v3 = vmul.f32 %v3035_v51, %v1621_v12  ;;  %v1843_v56 = vadd.f32 %v1842_v24, %v1758_v31  ;;  %v1770_v12 = vmul.f32 %v3039_v60, %v1597_v57 }
 0x34c   :  { %v1859_v19 = vadd.f32 %v1739_v3, %v1735_v11  ;;  %v1844_v45 = vadd.f32 %v1843_v56, %v1762_v36  ;;  %v1886_v36 = vlaneseq }
 0x34d   :  { %v1622_v46 = vpop.trf.xlu1  ;;  %v1598_v63 = vpop.trf.xlu0 }
 0x34e   :  { %v1743_v13 = vmul.f32 %v3041_v61, %v1622_v46  ;;  %v1774_v49 = vmul.f32 %v3072_v34, %v1598_v63  ;;  %vm1949_vm1 = vcmp.lt.s32.totalorder %v1886_v36, 512 }
 0x350   :  { %v1860_v51 = vadd.f32 %v1859_v19, %v1743_v13 }
 0x351   :  { %v1623_v48 = vpop.trf.xlu1  ;;  %v1599_v42 = vpop.trf.xlu0 }
 0x352   :  { %v1747_v25 = vmul.f32 %v3050_v8, %v1623_v48  ;;  %v1845_v48 = vadd.f32 %v1844_v45, %v1766_v38  ;;  %v1778_v53 = vmul.f32 %v3045_v0, %v1599_v42 }
 0x354   :  { %v1861_v26 = vadd.f32 %v1860_v51, %v1747_v25 }
 0x355   :  { %v1624_v50 = vpop.trf.xlu1  ;;  %v1600_v61 = vpop.trf.xlu0 }
 0x356   :  { %v1751_v20 = vmul.f32 %v3057_v1, %v1624_v50  ;;  %v1782_v57 = vmul.f32 %v3077_v59, %v1600_v61 }
 0x358   :  { %v1862_v33 = vadd.f32 %v1861_v26, %v1751_v20 }
 0x359   :  { %v1625_v52 = vpop.trf.xlu1  ;;  %v1601_v44 = vpop.trf.xlu0 }
 0x35a   :  { %v1755_v27 = vmul.f32 %v3026_v14, %v1625_v52  ;;  %v1846_v52 = vadd.f32 %v1845_v48, %v1770_v12  ;;  %v1786_v63 = vmul.f32 %v3055_v16, %v1601_v44 }
 0x35c   :  { %v1863_v37 = vadd.f32 %v1862_v33, %v1755_v27 }
 0x35d   :  { %v1626_v55 = vpop.trf.xlu1 }
 0x35e   :  { %v1759_v8 = vmul.f32 %v3061_v58, %v1626_v55  ;;  %v1602_v55 = vpop.trf.xlu0 }
 0x35f   :  { %v1790_v13 = vmul.f32 %v3082_v6, %v1602_v55 }
 0x360   :  { %v1864_v43 = vadd.f32 %v1863_v37, %v1759_v8 }
 0x361   :  { %v1627_v54 = vpop.trf.xlu1 }
 0x362   :  { %v1763_v1 = vmul.f32 %v3031_v32, %v1627_v54  ;;  %v1603_v7 = vpop.trf.xlu0 }
 0x364   :  { %v1865_v46 = vadd.f32 %v1864_v43, %v1763_v1 }
 0x365   :  { %v1628_v62 = vpop.trf.xlu1 }
 0x366   :  { %v1767_v14 = vmul.f32 %v3067_v39, %v1628_v62  ;;  %v1847_v62 = vadd.f32 %v1846_v52, %v1774_v49 }
 0x368   :  { %v1866_v50 = vadd.f32 %v1865_v46, %v1767_v14  ;;  %v1848_v3 = vadd.f32 %v1847_v62, %v1778_v53 }
 0x369   :  { %v1629_v2 = vpop.trf.xlu1 }
 0x36a   :  { %v1771_v58 = vmul.f32 %v3039_v60, %v1629_v2  ;;  %v1849_v11 = vadd.f32 %v1848_v3, %v1782_v57 }
 0x36c   :  { %v1867_v54 = vadd.f32 %v1866_v50, %v1771_v58 }
 0x36d   :  { %v1630_v15 = vpop.trf.xlu1 }
 0x36e   :  { %v1775_v32 = vmul.f32 %v3072_v34, %v1630_v15  ;;  %v1850_v15 = vadd.f32 %v1849_v11, %v1786_v63 }
 0x370   :  { %v1868_v9 = vadd.f32 %v1867_v54, %v1775_v32  ;;  %v1851_v19 = vadd.f32 %v1850_v15, %v1790_v13 }
 0x371   :  { %v1631_v23 = vpop.trf.xlu1 }
 0x372   :  { %v1779_v39 = vmul.f32 %v3045_v0, %v1631_v23 }
 0x374   :  { %v1869_v5 = vadd.f32 %v1868_v9, %v1779_v39 }
 0x375   :  { %v1632_v35 = vpop.trf.xlu1 }
 0x376   :  { %v1783_v60 = vmul.f32 %v3077_v59, %v1632_v35 }
 0x378   :  { %v1870_v42 = vadd.f32 %v1869_v5, %v1783_v60 }
 0x379   :  { %v1633_v47 = vpop.trf.xlu1 }
 0x37a   :  { %v1787_v34 = vmul.f32 %v3055_v16, %v1633_v47 }
 0x37c   :  { %v1871_v18 = vadd.f32 %v1870_v42, %v1787_v34 }
 0x37d   :  { %v1634_v2 = vpop.trf.xlu1 }
 0x37e   :  { %v1791_v0 = vmul.f32 %v3082_v6, %v1634_v2 }
 0x380   :  { %v1872_v25 = vadd.f32 %v1871_v18, %v1791_v0 }
 0x381   :  { %v1635_v21 = vpop.trf.xlu1 }
 0x389   :  { %v1730_v59 = vpop.permute.xlu0 %1729 }
 0x38a   :  { %v1792_v4 = vmul.f32 %v1730_v59, %v3105_v10  ;;  %v1793_v17 = vmul.f32 %v1730_v59, %v3116_v41  ;;  %v1794_v51 = vmul.f32 %v1730_v59, %v1603_v7  ;;  %v1795_v20 = vmul.f32 %v1730_v59, %v1635_v21 }
 0x38b   :  { %v2391_v7 = vmov 1966171168  }
 0x38c   :  { %v1810_v16 = vadd.f32 %v3102_v22, %v1792_v4  ;;  %v1831_v23 = vadd.f32 %v3114_v40, %v1793_v17  ;;  %v1852_v29 = vadd.f32 %v1851_v19, %v1794_v51  ;;  %v1873_v30 = vadd.f32 %v1872_v25, %v1795_v20 }
 0x38d   :  { %v1887_v40 = vshrl.u32 %v1886_v36, 7  ;;  %v1925_v11 = vunpack.c.l.s4 %v2391_v7 }
 0x38e   :  { %v1811_v26 = vrot.slane %v1810_v16, 4  ;;  %v1832_v6 = vrot.slane %v1831_v23, 4  ;;  %v1853_v61 = vrot.slane %v1852_v29, 4  ;;  %v1874_v27 = vrot.slane %v1873_v30, 4 }
 0x38f   :  { %v1888_v45 = vsub.s32 0, %v1887_v40  ;;  %v1926_v13 = vunpack.c.0.s8 %v1925_v11 }
 0x390   :  { %v1812_v28 = vadd.f32 %v1811_v26, %v1810_v16  ;;  %v1833_v31 = vadd.f32 %v1832_v6, %v1831_v23  ;;  %v1854_v33 = vadd.f32 %v1853_v61, %v1852_v29  ;;  %v1875_v8 = vadd.f32 %v1874_v27, %v1873_v30 }
 0x391   :  { %v1929_v0 = vsub.s32 %v1926_v13, %v1887_v40 }
 0x392   :  { %v1813_v35 = vrot.slane %v1812_v28, 2  ;;  %v1834_v10 = vrot.slane %v1833_v31, 2  ;;  %v1855_v24 = vrot.slane %v1854_v33, 2  ;;  %v1876_v41 = vrot.slane %v1875_v8, 2 }
 0x394   :  { %v1814_v37 = vadd.f32 %v1813_v35, %v1812_v28  ;;  %v1835_v1 = vadd.f32 %v1834_v10, %v1833_v31  ;;  %v1856_v22 = vadd.f32 %v1855_v24, %v1854_v33  ;;  %v1877_v56 = vadd.f32 %v1876_v41, %v1875_v8 }
 0x396   :  { %v1815_v38 = vrot.slane %v1814_v37, 1  ;;  %v1836_v44 = vrot.slane %v1835_v1, 1  ;;  %v1857_v43 = vrot.slane %v1856_v22, 1  ;;  %v1878_v14 = vrot.slane %v1877_v56, 1 }
 0x398   :  { %v1816_v46 = vadd.f32 %v1815_v38, %v1814_v37  ;;  %v1837_v58 = vadd.f32 %v1836_v44, %v1835_v1  ;;  %v1858_v47 = vadd.f32 %v1857_v43, %v1856_v22  ;;  %v1879_v48 = vadd.f32 %v1878_v14, %v1877_v56 }
 0x39e   :  { %v1884_v12 = vpop.permute.xlu1 %1883 }
 0x39f   :  { %v1889_v49 = vrot.slane %v1884_v12, %v1888_v45 }
 0x3a1   :  { %v1890_v50 = vadd.f32 %v1889_v49, %v1816_v46  ;;  %v1891_v32 = vadd.f32 %v1889_v49, %v1837_v58  ;;  %v1892_v52 = vadd.f32 %v1889_v49, %v1858_v47  ;;  %v1893_v53 = vadd.f32 %v1889_v49, %v1879_v48 }
 0x3a3   :  { %v2008_v55 = vmul.f32 -1.442695, %v1890_v50  ;;  %v2009_v54 = vmul.f32 -1.442695, %v1891_v32  ;;  %v2010_v39 = vmul.f32 -1.442695, %v1892_v52 }
 0x3a4   :  { %v2011_v62 = vmul.f32 -1.442695, %v1893_v53 }
 0x3a5   :  { %2374 = vpow2.f32 %v2008_v55 }
 0x3a6   :  { %2376 = vpow2.f32 %v2009_v54 }
 0x3a7   :  { %2378 = vpow2.f32 %v2010_v39 }
 0x3a8   :  { %2380 = vpow2.f32 %v2011_v62 }
 0x3b2   :  { %v2375_v57 = vpop.eup %2374 }
 0x3b3   :  { %v2377_v9 = vpop.eup %2376  ;;  %v1906_v60 = vadd.f32 1.0, %v2375_v57 }
 0x3b4   :  { %v2379_v2 = vpop.eup %2378  ;;  %v1907_v3 = vadd.f32 1.0, %v2377_v9 }
 0x3b5   :  { %v2381_v63 = vpop.eup %2380  ;;  %v1908_v5 = vadd.f32 1.0, %v2379_v2  ;;  %2382 = vrcp.f32 %v1906_v60 }
 0x3b6   :  { %v1909_v34 = vadd.f32 1.0, %v2381_v63  ;;  %2384 = vrcp.f32 %v1907_v3 }
 0x3b7   :  { %2386 = vrcp.f32 %v1908_v5 }
 0x3b8   :  { %2388 = vrcp.f32 %v1909_v34 }
 0x3c2   :  { %v2383_v42 = vpop.eup %2382 }
 0x3c3   :  { %v2385_v15 = vpop.eup %2384 }
 0x3c4   :  { %v2387_v18 = vpop.eup %2386  ;;  %v1922_v21 = vcombine.low %v2383_v42, %v2385_v15 }
 0x3c5   :  { %v2389_v19 = vpop.eup %2388 }
 0x3c6   :  { %v1923_v25 = vcombine.low %v2387_v18, %v2389_v19  ;;  %v1930_v59 = vrot.slane %v1922_v21, %v1929_v0 }
 0x3c8   :  { %v1937_v4 = vrot.slane %v1923_v25, %v1929_v0 }
 0x3ca   :  { %v1938_v17 = vcombine.low %v1930_v59, %v1937_v4 }
 0x3cc   :  { %v1945_v51 = vrot.slane %v1938_v17, %v1929_v0 }
 0x3ce   :  { %1951 = vst.msk [vmem:[%s3164_s9] sm:$0xf] %vm1949_vm1, %v1945_v51 }

</bundles_post_ra>
